<compile_context>
chip_gen: v7x
topology: tpu7x:2x2x1
jax: 0.10.0
libtpu: 0.0.40
codegen_flags: <defaults>
</compile_context>

<pallas_src>
import functools

import jax
import jax.numpy as jnp
from jax.experimental import pallas as pl

EPS = 1e-8


# ----------------------------------------------------------------------------
# Single fused kernel
#   inputs : V flattened views (B*S, D_i), action (B, S, A),
#            per-view encoder weights (w1,b1,w_head,b_head),
#            per-view decoder weights (w1,b1,w2,b2),
#            sa_encoder weights (w1,b1,w_head,b_head)
#   outputs: enc_out (B*S, V*2L)  = [mu_0|lv_0|mu_1|lv_1|...]   (per-view posteriors)
#            seq_out (B, S, 4L)   = [mu_J | logvar_J | mu_prior | logvar_prior]
#            recon_i (B*S, D_i)   for each view
# ----------------------------------------------------------------------------
def _mvssm_kernel(*refs, n_views, n_latents, seq_len, batch, view_binaries):
    V, L, S, B = n_views, n_latents, seq_len, batch
    it = iter(refs)
    view_refs = [next(it) for _ in range(V)]
    act_ref = next(it)
    enc_w = [[next(it) for _ in range(4)] for _ in range(V)]   # w1, b1, w_head, b_head
    dec_w = [[next(it) for _ in range(4)] for _ in range(V)]   # w1, b1, w2, b2
    sa_w1, sa_b1, sa_wh, sa_bh = [next(it) for _ in range(4)]
    enc_out_ref = next(it)
    seq_out_ref = next(it)
    recon_refs = [next(it) for _ in range(V)]

    # ---- 1) per-view encoders + fused product-of-experts pre-reduction ------
    num = None        # sum_i mu_i * T_i
    den = None        # sum_i T_i,  T_i = 1 / (exp(logvar_i) + eps)
    enc_slabs = []
    for i in range(V):
        w1, b1, wh, bh = enc_w[i]
        x = view_refs[i][...]                                                  # (B*S, D_i)
        h = jnp.maximum(
            jnp.dot(x, w1[...], preferred_element_type=jnp.float32) + b1[...], 0.0)
        post = jnp.dot(h, wh[...], preferred_element_type=jnp.float32) + bh[...]   # (B*S, 2L)
        enc_slabs.append(post)
        mu, lv = post[:, :L], post[:, L:]
        T = pl.reciprocal(jnp.exp(lv) + EPS, approx=True)
        muT = mu * T
        num = muT if num is None else num + muT
        den = T if den is None else den + T
    enc_out_ref[...] = jnp.concatenate(enc_slabs, axis=-1)                     # (B*S, V*2L)

    # ---- 2) recurrence over time (fully unrolled; S is static) --------------
    act = act_ref[...]                         # (B, S, A), loaded once
    num3 = num.reshape(B, S, L)                # aligned leading-dim split (S == sublane tile)
    den3 = den.reshape(B, S, L)

    prior_mu = jnp.zeros((B, L), jnp.float32)
    prior_lv = jnp.zeros((B, L), jnp.float32)
    seq_rows = []
    for t in range(S):
        num_t = num3[:, t, :]
        den_t = den3[:, t, :]
        if t > 0:   # t == 0: prior_expert (zeros) is recorded but NOT fused (use_prior=None)
            Tp = pl.reciprocal(jnp.exp(prior_lv) + EPS, approx=True)
            num_t = num_t + prior_mu * Tp
            den_t = den_t + Tp
        inv_den = pl.reciprocal(den_t, approx=True)
        mu_J = num_t * inv_den                                   # IVWAvg mean
        lv_J = jnp.log(inv_den + EPS)                            # IVWAvg logvar
        seq_rows.append(jnp.concatenate([mu_J, lv_J, prior_mu, prior_lv], axis=-1))  # (B, 4L)
        z = mu_J                                                 # eval-mode reparameterize
        if t + 1 < S:                                            # next-step learned prior
            za = jnp.concatenate([z, act[:, t, :]], axis=-1)     # (B, L+A)
            hh = jnp.maximum(
                jnp.dot(za, sa_w1[...], preferred_element_type=jnp.float32) + sa_b1[...], 0.0)
            head = jnp.dot(hh, sa_wh[...], preferred_element_type=jnp.float32) + sa_bh[...]
            prior_mu, prior_lv = head[:, :L], head[:, L:]

    seq = jnp.stack(seq_rows, axis=1)                            # (B, S, 4L) lane-dense
    seq_out_ref[...] = seq                                       # single unmasked store

    # ---- 3) per-view decoders on z.view(-1, L) -------------------------------
    z_flat = seq[:, :, :L].reshape(B * S, L)                     # row order b*S + t
    for i in range(V):
        dw1, db1, dw2, db2 = dec_w[i]
        h = jnp.maximum(
            jnp.dot(z_flat, dw1[...], preferred_element_type=jnp.float32) + db1[...], 0.0)
        y = jnp.dot(h, dw2[...], preferred_element_type=jnp.float32) + db2[...]
        if view_binaries[i]:
            y = jax.nn.sigmoid(y)
        recon_refs[i][...] = y


# ----------------------------------------------------------------------------
# MVSSM.forward wrapper (one pallas_call; only free reshapes / lane slices outside)
# ----------------------------------------------------------------------------
def mvssm_forward(views, action, params, *, n_latents, view_binaries):
    B, S = views[0].shape[0], views[0].shape[1]
    L = n_latents
    V = len(views)
    N = B * S

    inputs = [v.reshape(N, v.shape[-1]) for v in views]          # bitcast reshape, no copy
    inputs.append(action)
    for p in params["encoders"]:
        inputs += [p["w1"], p["b1"], p["w_head"], p["b_head"]]
    for p in params["decoders"]:
        inputs += [p["w1"], p["b1"], p["w2"], p["b2"]]
    sa = params["sa_encoder"]
    inputs += [sa["w1"], sa["b1"], sa["w_head"], sa["b_head"]]

    out_shapes = (
        jax.ShapeDtypeStruct((N, 2 * L * V), jnp.float32),       # per-view [mu|logvar] slab
        jax.ShapeDtypeStruct((B, S, 4 * L), jnp.float32),        # [mu_J|lv_J|mu_pr|lv_pr]
    ) + tuple(jax.ShapeDtypeStruct((N, v.shape[-1]), jnp.float32) for v in views)

    kernel = functools.partial(
        _mvssm_kernel, n_views=V, n_latents=L, seq_len=S, batch=B,
        view_binaries=tuple(bool(b) for b in view_binaries))

    outs = pl.pallas_call(kernel, out_shape=out_shapes)(*inputs)
    enc_out, seq_out = outs[0], outs[1]
    views_recon = list(outs[2:])

    mu_list = [enc_out[:, 2 * L * i: 2 * L * i + L].reshape(B, S, L) for i in range(V)]
    lv_list = [enc_out[:, 2 * L * i + L: 2 * L * (i + 1)].reshape(B, S, L) for i in range(V)]
    mu_J = seq_out[..., :L]
    logvar_J = seq_out[..., L:2 * L]
    mu_prior = seq_out[..., 2 * L:3 * L]
    logvar_prior = seq_out[..., 3 * L:]
    z = mu_J                                                     # eval-mode: z == mu_J
    return (views_recon, mu_J, logvar_J, mu_list, lv_list, mu_prior, logvar_prior, z)


# ----------------------------------------------------------------------------
# Parameter construction (deterministic, PyTorch Linear-style uniform init)
# ----------------------------------------------------------------------------
def _init_linear(key, din, dout):
    kw, kb = jax.random.split(key)
    bound = 1.0 / jnp.sqrt(jnp.float32(din))
    w = jax.random.uniform(kw, (din, dout), jnp.float32, -bound, bound)
    b = jax.random.uniform(kb, (1, dout), jnp.float32, -bound, bound)
    return w, b


def init_params(key, *, n_latents, hidden_size, action_size, view_sizes):
    keys = jax.random.split(key, 2 * len(view_sizes) + 1)
    params = {"encoders": [], "decoders": []}
    for i, vs in enumerate(view_sizes):
        ke = jax.random.split(keys[i], 3)
        w1, b1 = _init_linear(ke[0], vs, hidden_size)
        wmu, bmu = _init_linear(ke[1], hidden_size, n_latents)
        wlv, blv = _init_linear(ke[2], hidden_size, n_latents)
        params["encoders"].append(dict(
            w1=w1, b1=b1,
            w_head=jnp.concatenate([wmu, wlv], axis=1),          # fused (H, 2L) head
            b_head=jnp.concatenate([bmu, blv], axis=1)))
        kd = jax.random.split(keys[len(view_sizes) + i], 2)
        dw1, db1 = _init_linear(kd[0], n_latents, hidden_size)
        dw2, db2 = _init_linear(kd[1], hidden_size, vs)
        params["decoders"].append(dict(w1=dw1, b1=db1, w2=dw2, b2=db2))
    ks = jax.random.split(keys[-1], 3)
    w1, b1 = _init_linear(ks[0], n_latents + action_size, hidden_size)   # single (L+A, H)
    wmu, bmu = _init_linear(ks[1], hidden_size, n_latents)
    wlv, blv = _init_linear(ks[2], hidden_size, n_latents)
    params["sa_encoder"] = dict(
        w1=w1, b1=b1,
        w_head=jnp.concatenate([wmu, wlv], axis=1),
        b_head=jnp.concatenate([bmu, blv], axis=1))
    return params


if __name__ == "__main__":
    # small, deterministic example consistent with the module's forward
    B, S = 4, 8
    n_latents = 32
    hidden_size = 32
    action_size = 8
    view_sizes = [16, 24]
    view_binaries = [True, False]

    key = jax.random.PRNGKey(0)
    k_par, k_v0, k_v1, k_a = jax.random.split(key, 4)
    params = init_params(k_par, n_latents=n_latents, hidden_size=hidden_size,
                         action_size=action_size, view_sizes=view_sizes)

    views = [
        jax.random.uniform(k_v0, (B, S, view_sizes[0]), jnp.float32),   # binary-ish view
        jax.random.normal(k_v1, (B, S, view_sizes[1]), jnp.float32),    # continuous view
    ]
    action = jax.random.normal(k_a, (B, S, action_size), jnp.float32)

    out = mvssm_forward(views, action, params,
                        n_latents=n_latents, view_binaries=view_binaries)
    jax.block_until_ready(out)

    views_recon, mu_J, logvar_J, mu_pv, lv_pv, mu_prior, logvar_prior, z = out
    assert views_recon[0].shape == (B * S, view_sizes[0])
    assert views_recon[1].shape == (B * S, view_sizes[1])
    assert mu_J.shape == logvar_J.shape == z.shape == (B, S, n_latents)
    assert mu_prior.shape == logvar_prior.shape == (B, S, n_latents)
    assert all(m.shape == (B, S, n_latents) for m in mu_pv)
    assert all(m.shape == (B, S, n_latents) for m in lv_pv)
    finite = (views_recon + [mu_J, logvar_J, mu_prior, logvar_prior, z])
    assert all(bool(jnp.all(jnp.isfinite(a))) for a in finite)
    print("KERNEL_OK")
</pallas_src>

<mosaic_0001>
module attributes {stable_mosaic.version = 11 : i64} {
  func.func @_mvssm_kernel(%arg0: memref<32x16xf32, #tpu.memory_space<vmem>>, %arg1: memref<32x24xf32, #tpu.memory_space<vmem>>, %arg2: memref<4x8x8xf32, #tpu.memory_space<vmem>>, %arg3: memref<16x32xf32, #tpu.memory_space<vmem>>, %arg4: memref<1x32xf32, #tpu.memory_space<vmem>>, %arg5: memref<32x64xf32, #tpu.memory_space<vmem>>, %arg6: memref<1x64xf32, #tpu.memory_space<vmem>>, %arg7: memref<24x32xf32, #tpu.memory_space<vmem>>, %arg8: memref<1x32xf32, #tpu.memory_space<vmem>>, %arg9: memref<32x64xf32, #tpu.memory_space<vmem>>, %arg10: memref<1x64xf32, #tpu.memory_space<vmem>>, %arg11: memref<32x32xf32, #tpu.memory_space<vmem>>, %arg12: memref<1x32xf32, #tpu.memory_space<vmem>>, %arg13: memref<32x16xf32, #tpu.memory_space<vmem>>, %arg14: memref<1x16xf32, #tpu.memory_space<vmem>>, %arg15: memref<32x32xf32, #tpu.memory_space<vmem>>, %arg16: memref<1x32xf32, #tpu.memory_space<vmem>>, %arg17: memref<32x24xf32, #tpu.memory_space<vmem>>, %arg18: memref<1x24xf32, #tpu.memory_space<vmem>>, %arg19: memref<40x32xf32, #tpu.memory_space<vmem>>, %arg20: memref<1x32xf32, #tpu.memory_space<vmem>>, %arg21: memref<32x64xf32, #tpu.memory_space<vmem>>, %arg22: memref<1x64xf32, #tpu.memory_space<vmem>>, %arg23: memref<32x128xf32, #tpu.memory_space<vmem>>, %arg24: memref<4x8x128xf32, #tpu.memory_space<vmem>>, %arg25: memref<32x16xf32, #tpu.memory_space<vmem>>, %arg26: memref<32x24xf32, #tpu.memory_space<vmem>>) attributes {dimension_semantics = [], scalar_prefetch = 0 : i64, scratch_operands = 0 : i64, tpu.core_type = #tpu.core_type<tc>} {
    %c0 = arith.constant 0 : index
    %c0_0 = arith.constant 0 : index
    %0 = vector.load %arg0[%c0, %c0_0] : memref<32x16xf32, #tpu.memory_space<vmem>>, vector<32x16xf32>
    %c0_1 = arith.constant 0 : index
    %c0_2 = arith.constant 0 : index
    %1 = vector.load %arg3[%c0_1, %c0_2] : memref<16x32xf32, #tpu.memory_space<vmem>>, vector<16x32xf32>
    %cst = arith.constant dense<0.000000e+00> : vector<32x32xf32>
    %2 = tpu.matmul %0, %1, %cst {dimension_numbers = #tpu.dot_dimension_numbers<[1], [0], [0], [1], [0, 0, 1, 1], [], []>} : vector<32x16xf32>, vector<16x32xf32>, vector<32x32xf32> -> vector<32x32xf32>
    %c0_3 = arith.constant 0 : index
    %c0_4 = arith.constant 0 : index
    %3 = vector.load %arg4[%c0_3, %c0_4] : memref<1x32xf32, #tpu.memory_space<vmem>>, vector<1x32xf32>
    %4 = vector.broadcast %3 : vector<1x32xf32> to vector<32x32xf32>
    %5 = arith.addf %2, %4 : vector<32x32xf32>
    %cst_5 = arith.constant 0.000000e+00 : f32
    %6 = vector.broadcast %cst_5 : f32 to vector<32x32xf32>
    %7 = arith.maximumf %5, %6 : vector<32x32xf32>
    %c0_6 = arith.constant 0 : index
    %c0_7 = arith.constant 0 : index
    %8 = vector.load %arg5[%c0_6, %c0_7] : memref<32x64xf32, #tpu.memory_space<vmem>>, vector<32x64xf32>
    %cst_8 = arith.constant dense<0.000000e+00> : vector<32x64xf32>
    %9 = tpu.matmul %7, %8, %cst_8 {dimension_numbers = #tpu.dot_dimension_numbers<[1], [0], [0], [1], [0, 0, 1, 1], [], []>} : vector<32x32xf32>, vector<32x64xf32>, vector<32x64xf32> -> vector<32x64xf32>
    %c0_9 = arith.constant 0 : index
    %c0_10 = arith.constant 0 : index
    %10 = vector.load %arg6[%c0_9, %c0_10] : memref<1x64xf32, #tpu.memory_space<vmem>>, vector<1x64xf32>
    %11 = vector.broadcast %10 : vector<1x64xf32> to vector<32x64xf32>
    %12 = arith.addf %9, %11 : vector<32x64xf32>
    %13 = vector.extract_strided_slice %12 {offsets = [0, 0], sizes = [32, 32], strides = [1, 1]} : vector<32x64xf32> to vector<32x32xf32>
    %14 = vector.extract_strided_slice %12 {offsets = [0, 32], sizes = [32, 32], strides = [1, 1]} : vector<32x64xf32> to vector<32x32xf32>
    %15 = math.exp %14 : vector<32x32xf32>
    %cst_11 = arith.constant 9.99999993E-9 : f32
    %16 = vector.broadcast %cst_11 : f32 to vector<32x32xf32>
    %17 = arith.addf %15, %16 : vector<32x32xf32>
    %18 = tpu.reciprocal %17 {approx = true} : vector<32x32xf32> -> vector<32x32xf32>
    %19 = arith.mulf %13, %18 : vector<32x32xf32>
    %c0_12 = arith.constant 0 : index
    %c0_13 = arith.constant 0 : index
    %20 = vector.load %arg1[%c0_12, %c0_13] : memref<32x24xf32, #tpu.memory_space<vmem>>, vector<32x24xf32>
    %c0_14 = arith.constant 0 : index
    %c0_15 = arith.constant 0 : index
    %21 = vector.load %arg7[%c0_14, %c0_15] : memref<24x32xf32, #tpu.memory_space<vmem>>, vector<24x32xf32>
    %cst_16 = arith.constant dense<0.000000e+00> : vector<32x32xf32>
    %22 = tpu.matmul %20, %21, %cst_16 {dimension_numbers = #tpu.dot_dimension_numbers<[1], [0], [0], [1], [0, 0, 1, 1], [], []>} : vector<32x24xf32>, vector<24x32xf32>, vector<32x32xf32> -> vector<32x32xf32>
    %c0_17 = arith.constant 0 : index
    %c0_18 = arith.constant 0 : index
    %23 = vector.load %arg8[%c0_17, %c0_18] : memref<1x32xf32, #tpu.memory_space<vmem>>, vector<1x32xf32>
    %24 = vector.broadcast %23 : vector<1x32xf32> to vector<32x32xf32>
    %25 = arith.addf %22, %24 : vector<32x32xf32>
    %cst_19 = arith.constant 0.000000e+00 : f32
    %26 = vector.broadcast %cst_19 : f32 to vector<32x32xf32>
    %27 = arith.maximumf %25, %26 : vector<32x32xf32>
    %c0_20 = arith.constant 0 : index
    %c0_21 = arith.constant 0 : index
    %28 = vector.load %arg9[%c0_20, %c0_21] : memref<32x64xf32, #tpu.memory_space<vmem>>, vector<32x64xf32>
    %cst_22 = arith.constant dense<0.000000e+00> : vector<32x64xf32>
    %29 = tpu.matmul %27, %28, %cst_22 {dimension_numbers = #tpu.dot_dimension_numbers<[1], [0], [0], [1], [0, 0, 1, 1], [], []>} : vector<32x32xf32>, vector<32x64xf32>, vector<32x64xf32> -> vector<32x64xf32>
    %c0_23 = arith.constant 0 : index
    %c0_24 = arith.constant 0 : index
    %30 = vector.load %arg10[%c0_23, %c0_24] : memref<1x64xf32, #tpu.memory_space<vmem>>, vector<1x64xf32>
    %31 = vector.broadcast %30 : vector<1x64xf32> to vector<32x64xf32>
    %32 = arith.addf %29, %31 : vector<32x64xf32>
    %33 = vector.extract_strided_slice %32 {offsets = [0, 0], sizes = [32, 32], strides = [1, 1]} : vector<32x64xf32> to vector<32x32xf32>
    %34 = vector.extract_strided_slice %32 {offsets = [0, 32], sizes = [32, 32], strides = [1, 1]} : vector<32x64xf32> to vector<32x32xf32>
    %35 = math.exp %34 : vector<32x32xf32>
    %cst_25 = arith.constant 9.99999993E-9 : f32
    %36 = vector.broadcast %cst_25 : f32 to vector<32x32xf32>
    %37 = arith.addf %35, %36 : vector<32x32xf32>
    %38 = tpu.reciprocal %37 {approx = true} : vector<32x32xf32> -> vector<32x32xf32>
    %39 = arith.mulf %33, %38 : vector<32x32xf32>
    %40 = arith.addf %19, %39 : vector<32x32xf32>
    %41 = arith.addf %18, %38 : vector<32x32xf32>
    %42 = tpu.concatenate %12, %32 in 1 : vector<32x64xf32>, vector<32x64xf32> -> vector<32x128xf32>
    %c0_26 = arith.constant 0 : index
    %c0_27 = arith.constant 0 : index
    %43 = vector.load %arg23[%c0_26, %c0_27] : memref<32x128xf32, #tpu.memory_space<vmem>>, vector<32x128xf32>
    tpu.vector_store %arg23[%c0_26, %c0_27], %42 {strides = array<i32>} : memref<32x128xf32, #tpu.memory_space<vmem>>, vector<32x128xf32>,
    %c0_28 = arith.constant 0 : index
    %c0_29 = arith.constant 0 : index
    %c0_30 = arith.constant 0 : index
    %44 = vector.load %arg2[%c0_28, %c0_29, %c0_30] : memref<4x8x8xf32, #tpu.memory_space<vmem>>, vector<4x8x8xf32>
    %45 = vector.shape_cast %40 : vector<32x32xf32> to vector<4x8x32xf32>
    %46 = vector.shape_cast %41 : vector<32x32xf32> to vector<4x8x32xf32>
    %cst_31 = arith.constant 0.000000e+00 : f32
    %47 = vector.broadcast %cst_31 : f32 to vector<4x32xf32>
    %cst_32 = arith.constant 0.000000e+00 : f32
    %48 = vector.broadcast %cst_32 : f32 to vector<4x32xf32>
    %49 = vector.extract_strided_slice %45 {offsets = [0, 0, 0], sizes = [4, 1, 32], strides = [1, 1, 1]} : vector<4x8x32xf32> to vector<4x1x32xf32>
    %50 = vector.shape_cast %49 : vector<4x1x32xf32> to vector<4x32xf32>
    %51 = vector.extract_strided_slice %46 {offsets = [0, 0, 0], sizes = [4, 1, 32], strides = [1, 1, 1]} : vector<4x8x32xf32> to vector<4x1x32xf32>
    %52 = vector.shape_cast %51 : vector<4x1x32xf32> to vector<4x32xf32>
    %53 = tpu.reciprocal %52 {approx = true} : vector<4x32xf32> -> vector<4x32xf32>
    %54 = arith.mulf %50, %53 : vector<4x32xf32>
    %cst_33 = arith.constant 9.99999993E-9 : f32
    %55 = vector.broadcast %cst_33 : f32 to vector<4x32xf32>
    %56 = arith.addf %53, %55 : vector<4x32xf32>
    %57 = math.log %56 : vector<4x32xf32>
    %58 = tpu.concatenate %54, %57, %47, %48 in 1 : vector<4x32xf32>, vector<4x32xf32>, vector<4x32xf32>, vector<4x32xf32> -> vector<4x128xf32>
    %59 = vector.extract_strided_slice %44 {offsets = [0, 0, 0], sizes = [4, 1, 8], strides = [1, 1, 1]} : vector<4x8x8xf32> to vector<4x1x8xf32>
    %60 = vector.shape_cast %59 : vector<4x1x8xf32> to vector<4x8xf32>
    %61 = tpu.concatenate %54, %60 in 1 : vector<4x32xf32>, vector<4x8xf32> -> vector<4x40xf32>
    %c0_34 = arith.constant 0 : index
    %c0_35 = arith.constant 0 : index
    %62 = vector.load %arg19[%c0_34, %c0_35] : memref<40x32xf32, #tpu.memory_space<vmem>>, vector<40x32xf32>
    %cst_36 = arith.constant dense<0.000000e+00> : vector<4x32xf32>
    %63 = tpu.matmul %61, %62, %cst_36 {dimension_numbers = #tpu.dot_dimension_numbers<[1], [0], [0], [1], [0, 0, 1, 1], [], []>} : vector<4x40xf32>, vector<40x32xf32>, vector<4x32xf32> -> vector<4x32xf32>
    %c0_37 = arith.constant 0 : index
    %c0_38 = arith.constant 0 : index
    %64 = vector.load %arg20[%c0_37, %c0_38] : memref<1x32xf32, #tpu.memory_space<vmem>>, vector<1x32xf32>
    %65 = vector.broadcast %64 : vector<1x32xf32> to vector<4x32xf32>
    %66 = arith.addf %63, %65 : vector<4x32xf32>
    %cst_39 = arith.constant 0.000000e+00 : f32
    %67 = vector.broadcast %cst_39 : f32 to vector<4x32xf32>
    %68 = arith.maximumf %66, %67 : vector<4x32xf32>
    %c0_40 = arith.constant 0 : index
    %c0_41 = arith.constant 0 : index
    %69 = vector.load %arg21[%c0_40, %c0_41] : memref<32x64xf32, #tpu.memory_space<vmem>>, vector<32x64xf32>
    %cst_42 = arith.constant dense<0.000000e+00> : vector<4x64xf32>
    %70 = tpu.matmul %68, %69, %cst_42 {dimension_numbers = #tpu.dot_dimension_numbers<[1], [0], [0], [1], [0, 0, 1, 1], [], []>} : vector<4x32xf32>, vector<32x64xf32>, vector<4x64xf32> -> vector<4x64xf32>
    %c0_43 = arith.constant 0 : index
    %c0_44 = arith.constant 0 : index
    %71 = vector.load %arg22[%c0_43, %c0_44] : memref<1x64xf32, #tpu.memory_space<vmem>>, vector<1x64xf32>
    %72 = vector.broadcast %71 : vector<1x64xf32> to vector<4x64xf32>
    %73 = arith.addf %70, %72 : vector<4x64xf32>
    %74 = vector.extract_strided_slice %73 {offsets = [0, 0], sizes = [4, 32], strides = [1, 1]} : vector<4x64xf32> to vector<4x32xf32>
    %75 = vector.extract_strided_slice %73 {offsets = [0, 32], sizes = [4, 32], strides = [1, 1]} : vector<4x64xf32> to vector<4x32xf32>
    %76 = vector.extract_strided_slice %45 {offsets = [0, 1, 0], sizes = [4, 1, 32], strides = [1, 1, 1]} : vector<4x8x32xf32> to vector<4x1x32xf32>
    %77 = vector.shape_cast %76 : vector<4x1x32xf32> to vector<4x32xf32>
    %78 = vector.extract_strided_slice %46 {offsets = [0, 1, 0], sizes = [4, 1, 32], strides = [1, 1, 1]} : vector<4x8x32xf32> to vector<4x1x32xf32>
    %79 = vector.shape_cast %78 : vector<4x1x32xf32> to vector<4x32xf32>
    %80 = math.exp %75 : vector<4x32xf32>
    %cst_45 = arith.constant 9.99999993E-9 : f32
    %81 = vector.broadcast %cst_45 : f32 to vector<4x32xf32>
    %82 = arith.addf %80, %81 : vector<4x32xf32>
    %83 = tpu.reciprocal %82 {approx = true} : vector<4x32xf32> -> vector<4x32xf32>
    %84 = arith.mulf %74, %83 : vector<4x32xf32>
    %85 = arith.addf %77, %84 : vector<4x32xf32>
    %86 = arith.addf %79, %83 : vector<4x32xf32>
    %87 = tpu.reciprocal %86 {approx = true} : vector<4x32xf32> -> vector<4x32xf32>
    %88 = arith.mulf %85, %87 : vector<4x32xf32>
    %cst_46 = arith.constant 9.99999993E-9 : f32
    %89 = vector.broadcast %cst_46 : f32 to vector<4x32xf32>
    %90 = arith.addf %87, %89 : vector<4x32xf32>
    %91 = math.log %90 : vector<4x32xf32>
    %92 = tpu.concatenate %88, %91, %74, %75 in 1 : vector<4x32xf32>, vector<4x32xf32>, vector<4x32xf32>, vector<4x32xf32> -> vector<4x128xf32>
    %93 = vector.extract_strided_slice %44 {offsets = [0, 1, 0], sizes = [4, 1, 8], strides = [1, 1, 1]} : vector<4x8x8xf32> to vector<4x1x8xf32>
    %94 = vector.shape_cast %93 : vector<4x1x8xf32> to vector<4x8xf32>
    %95 = tpu.concatenate %88, %94 in 1 : vector<4x32xf32>, vector<4x8xf32> -> vector<4x40xf32>
    %c0_47 = arith.constant 0 : index
    %c0_48 = arith.constant 0 : index
    %96 = vector.load %arg19[%c0_47, %c0_48] : memref<40x32xf32, #tpu.memory_space<vmem>>, vector<40x32xf32>
    %cst_49 = arith.constant dense<0.000000e+00> : vector<4x32xf32>
    %97 = tpu.matmul %95, %96, %cst_49 {dimension_numbers = #tpu.dot_dimension_numbers<[1], [0], [0], [1], [0, 0, 1, 1], [], []>} : vector<4x40xf32>, vector<40x32xf32>, vector<4x32xf32> -> vector<4x32xf32>
    %c0_50 = arith.constant 0 : index
    %c0_51 = arith.constant 0 : index
    %98 = vector.load %arg20[%c0_50, %c0_51] : memref<1x32xf32, #tpu.memory_space<vmem>>, vector<1x32xf32>
    %99 = vector.broadcast %98 : vector<1x32xf32> to vector<4x32xf32>
    %100 = arith.addf %97, %99 : vector<4x32xf32>
    %cst_52 = arith.constant 0.000000e+00 : f32
    %101 = vector.broadcast %cst_52 : f32 to vector<4x32xf32>
    %102 = arith.maximumf %100, %101 : vector<4x32xf32>
    %c0_53 = arith.constant 0 : index
    %c0_54 = arith.constant 0 : index
    %103 = vector.load %arg21[%c0_53, %c0_54] : memref<32x64xf32, #tpu.memory_space<vmem>>, vector<32x64xf32>
    %cst_55 = arith.constant dense<0.000000e+00> : vector<4x64xf32>
    %104 = tpu.matmul %102, %103, %cst_55 {dimension_numbers = #tpu.dot_dimension_numbers<[1], [0], [0], [1], [0, 0, 1, 1], [], []>} : vector<4x32xf32>, vector<32x64xf32>, vector<4x64xf32> -> vector<4x64xf32>
    %c0_56 = arith.constant 0 : index
    %c0_57 = arith.constant 0 : index
    %105 = vector.load %arg22[%c0_56, %c0_57] : memref<1x64xf32, #tpu.memory_space<vmem>>, vector<1x64xf32>
    %106 = vector.broadcast %105 : vector<1x64xf32> to vector<4x64xf32>
    %107 = arith.addf %104, %106 : vector<4x64xf32>
    %108 = vector.extract_strided_slice %107 {offsets = [0, 0], sizes = [4, 32], strides = [1, 1]} : vector<4x64xf32> to vector<4x32xf32>
    %109 = vector.extract_strided_slice %107 {offsets = [0, 32], sizes = [4, 32], strides = [1, 1]} : vector<4x64xf32> to vector<4x32xf32>
    %110 = vector.extract_strided_slice %45 {offsets = [0, 2, 0], sizes = [4, 1, 32], strides = [1, 1, 1]} : vector<4x8x32xf32> to vector<4x1x32xf32>
    %111 = vector.shape_cast %110 : vector<4x1x32xf32> to vector<4x32xf32>
    %112 = vector.extract_strided_slice %46 {offsets = [0, 2, 0], sizes = [4, 1, 32], strides = [1, 1, 1]} : vector<4x8x32xf32> to vector<4x1x32xf32>
    %113 = vector.shape_cast %112 : vector<4x1x32xf32> to vector<4x32xf32>
    %114 = math.exp %109 : vector<4x32xf32>
    %cst_58 = arith.constant 9.99999993E-9 : f32
    %115 = vector.broadcast %cst_58 : f32 to vector<4x32xf32>
    %116 = arith.addf %114, %115 : vector<4x32xf32>
    %117 = tpu.reciprocal %116 {approx = true} : vector<4x32xf32> -> vector<4x32xf32>
    %118 = arith.mulf %108, %117 : vector<4x32xf32>
    %119 = arith.addf %111, %118 : vector<4x32xf32>
    %120 = arith.addf %113, %117 : vector<4x32xf32>
    %121 = tpu.reciprocal %120 {approx = true} : vector<4x32xf32> -> vector<4x32xf32>
    %122 = arith.mulf %119, %121 : vector<4x32xf32>
    %cst_59 = arith.constant 9.99999993E-9 : f32
    %123 = vector.broadcast %cst_59 : f32 to vector<4x32xf32>
    %124 = arith.addf %121, %123 : vector<4x32xf32>
    %125 = math.log %124 : vector<4x32xf32>
    %126 = tpu.concatenate %122, %125, %108, %109 in 1 : vector<4x32xf32>, vector<4x32xf32>, vector<4x32xf32>, vector<4x32xf32> -> vector<4x128xf32>
    %127 = vector.extract_strided_slice %44 {offsets = [0, 2, 0], sizes = [4, 1, 8], strides = [1, 1, 1]} : vector<4x8x8xf32> to vector<4x1x8xf32>
    %128 = vector.shape_cast %127 : vector<4x1x8xf32> to vector<4x8xf32>
    %129 = tpu.concatenate %122, %128 in 1 : vector<4x32xf32>, vector<4x8xf32> -> vector<4x40xf32>
    %c0_60 = arith.constant 0 : index
    %c0_61 = arith.constant 0 : index
    %130 = vector.load %arg19[%c0_60, %c0_61] : memref<40x32xf32, #tpu.memory_space<vmem>>, vector<40x32xf32>
    %cst_62 = arith.constant dense<0.000000e+00> : vector<4x32xf32>
    %131 = tpu.matmul %129, %130, %cst_62 {dimension_numbers = #tpu.dot_dimension_numbers<[1], [0], [0], [1], [0, 0, 1, 1], [], []>} : vector<4x40xf32>, vector<40x32xf32>, vector<4x32xf32> -> vector<4x32xf32>
    %c0_63 = arith.constant 0 : index
    %c0_64 = arith.constant 0 : index
    %132 = vector.load %arg20[%c0_63, %c0_64] : memref<1x32xf32, #tpu.memory_space<vmem>>, vector<1x32xf32>
    %133 = vector.broadcast %132 : vector<1x32xf32> to vector<4x32xf32>
    %134 = arith.addf %131, %133 : vector<4x32xf32>
    %cst_65 = arith.constant 0.000000e+00 : f32
    %135 = vector.broadcast %cst_65 : f32 to vector<4x32xf32>
    %136 = arith.maximumf %134, %135 : vector<4x32xf32>
    %c0_66 = arith.constant 0 : index
    %c0_67 = arith.constant 0 : index
    %137 = vector.load %arg21[%c0_66, %c0_67] : memref<32x64xf32, #tpu.memory_space<vmem>>, vector<32x64xf32>
    %cst_68 = arith.constant dense<0.000000e+00> : vector<4x64xf32>
    %138 = tpu.matmul %136, %137, %cst_68 {dimension_numbers = #tpu.dot_dimension_numbers<[1], [0], [0], [1], [0, 0, 1, 1], [], []>} : vector<4x32xf32>, vector<32x64xf32>, vector<4x64xf32> -> vector<4x64xf32>
    %c0_69 = arith.constant 0 : index
    %c0_70 = arith.constant 0 : index
    %139 = vector.load %arg22[%c0_69, %c0_70] : memref<1x64xf32, #tpu.memory_space<vmem>>, vector<1x64xf32>
    %140 = vector.broadcast %139 : vector<1x64xf32> to vector<4x64xf32>
    %141 = arith.addf %138, %140 : vector<4x64xf32>
    %142 = vector.extract_strided_slice %141 {offsets = [0, 0], sizes = [4, 32], strides = [1, 1]} : vector<4x64xf32> to vector<4x32xf32>
    %143 = vector.extract_strided_slice %141 {offsets = [0, 32], sizes = [4, 32], strides = [1, 1]} : vector<4x64xf32> to vector<4x32xf32>
    %144 = vector.extract_strided_slice %45 {offsets = [0, 3, 0], sizes = [4, 1, 32], strides = [1, 1, 1]} : vector<4x8x32xf32> to vector<4x1x32xf32>
    %145 = vector.shape_cast %144 : vector<4x1x32xf32> to vector<4x32xf32>
    %146 = vector.extract_strided_slice %46 {offsets = [0, 3, 0], sizes = [4, 1, 32], strides = [1, 1, 1]} : vector<4x8x32xf32> to vector<4x1x32xf32>
    %147 = vector.shape_cast %146 : vector<4x1x32xf32> to vector<4x32xf32>
    %148 = math.exp %143 : vector<4x32xf32>
    %cst_71 = arith.constant 9.99999993E-9 : f32
    %149 = vector.broadcast %cst_71 : f32 to vector<4x32xf32>
    %150 = arith.addf %148, %149 : vector<4x32xf32>
    %151 = tpu.reciprocal %150 {approx = true} : vector<4x32xf32> -> vector<4x32xf32>
    %152 = arith.mulf %142, %151 : vector<4x32xf32>
    %153 = arith.addf %145, %152 : vector<4x32xf32>
    %154 = arith.addf %147, %151 : vector<4x32xf32>
    %155 = tpu.reciprocal %154 {approx = true} : vector<4x32xf32> -> vector<4x32xf32>
    %156 = arith.mulf %153, %155 : vector<4x32xf32>
    %cst_72 = arith.constant 9.99999993E-9 : f32
    %157 = vector.broadcast %cst_72 : f32 to vector<4x32xf32>
    %158 = arith.addf %155, %157 : vector<4x32xf32>
    %159 = math.log %158 : vector<4x32xf32>
    %160 = tpu.concatenate %156, %159, %142, %143 in 1 : vector<4x32xf32>, vector<4x32xf32>, vector<4x32xf32>, vector<4x32xf32> -> vector<4x128xf32>
    %161 = vector.extract_strided_slice %44 {offsets = [0, 3, 0], sizes = [4, 1, 8], strides = [1, 1, 1]} : vector<4x8x8xf32> to vector<4x1x8xf32>
    %162 = vector.shape_cast %161 : vector<4x1x8xf32> to vector<4x8xf32>
    %163 = tpu.concatenate %156, %162 in 1 : vector<4x32xf32>, vector<4x8xf32> -> vector<4x40xf32>
    %c0_73 = arith.constant 0 : index
    %c0_74 = arith.constant 0 : index
    %164 = vector.load %arg19[%c0_73, %c0_74] : memref<40x32xf32, #tpu.memory_space<vmem>>, vector<40x32xf32>
    %cst_75 = arith.constant dense<0.000000e+00> : vector<4x32xf32>
    %165 = tpu.matmul %163, %164, %cst_75 {dimension_numbers = #tpu.dot_dimension_numbers<[1], [0], [0], [1], [0, 0, 1, 1], [], []>} : vector<4x40xf32>, vector<40x32xf32>, vector<4x32xf32> -> vector<4x32xf32>
    %c0_76 = arith.constant 0 : index
    %c0_77 = arith.constant 0 : index
    %166 = vector.load %arg20[%c0_76, %c0_77] : memref<1x32xf32, #tpu.memory_space<vmem>>, vector<1x32xf32>
    %167 = vector.broadcast %166 : vector<1x32xf32> to vector<4x32xf32>
    %168 = arith.addf %165, %167 : vector<4x32xf32>
    %cst_78 = arith.constant 0.000000e+00 : f32
    %169 = vector.broadcast %cst_78 : f32 to vector<4x32xf32>
    %170 = arith.maximumf %168, %169 : vector<4x32xf32>
    %c0_79 = arith.constant 0 : index
    %c0_80 = arith.constant 0 : index
    %171 = vector.load %arg21[%c0_79, %c0_80] : memref<32x64xf32, #tpu.memory_space<vmem>>, vector<32x64xf32>
    %cst_81 = arith.constant dense<0.000000e+00> : vector<4x64xf32>
    %172 = tpu.matmul %170, %171, %cst_81 {dimension_numbers = #tpu.dot_dimension_numbers<[1], [0], [0], [1], [0, 0, 1, 1], [], []>} : vector<4x32xf32>, vector<32x64xf32>, vector<4x64xf32> -> vector<4x64xf32>
    %c0_82 = arith.constant 0 : index
    %c0_83 = arith.constant 0 : index
    %173 = vector.load %arg22[%c0_82, %c0_83] : memref<1x64xf32, #tpu.memory_space<vmem>>, vector<1x64xf32>
    %174 = vector.broadcast %173 : vector<1x64xf32> to vector<4x64xf32>
    %175 = arith.addf %172, %174 : vector<4x64xf32>
    %176 = vector.extract_strided_slice %175 {offsets = [0, 0], sizes = [4, 32], strides = [1, 1]} : vector<4x64xf32> to vector<4x32xf32>
    %177 = vector.extract_strided_slice %175 {offsets = [0, 32], sizes = [4, 32], strides = [1, 1]} : vector<4x64xf32> to vector<4x32xf32>
    %178 = vector.extract_strided_slice %45 {offsets = [0, 4, 0], sizes = [4, 1, 32], strides = [1, 1, 1]} : vector<4x8x32xf32> to vector<4x1x32xf32>
    %179 = vector.shape_cast %178 : vector<4x1x32xf32> to vector<4x32xf32>
    %180 = vector.extract_strided_slice %46 {offsets = [0, 4, 0], sizes = [4, 1, 32], strides = [1, 1, 1]} : vector<4x8x32xf32> to vector<4x1x32xf32>
    %181 = vector.shape_cast %180 : vector<4x1x32xf32> to vector<4x32xf32>
    %182 = math.exp %177 : vector<4x32xf32>
    %cst_84 = arith.constant 9.99999993E-9 : f32
    %183 = vector.broadcast %cst_84 : f32 to vector<4x32xf32>
    %184 = arith.addf %182, %183 : vector<4x32xf32>
    %185 = tpu.reciprocal %184 {approx = true} : vector<4x32xf32> -> vector<4x32xf32>
    %186 = arith.mulf %176, %185 : vector<4x32xf32>
    %187 = arith.addf %179, %186 : vector<4x32xf32>
    %188 = arith.addf %181, %185 : vector<4x32xf32>
    %189 = tpu.reciprocal %188 {approx = true} : vector<4x32xf32> -> vector<4x32xf32>
    %190 = arith.mulf %187, %189 : vector<4x32xf32>
    %cst_85 = arith.constant 9.99999993E-9 : f32
    %191 = vector.broadcast %cst_85 : f32 to vector<4x32xf32>
    %192 = arith.addf %189, %191 : vector<4x32xf32>
    %193 = math.log %192 : vector<4x32xf32>
    %194 = tpu.concatenate %190, %193, %176, %177 in 1 : vector<4x32xf32>, vector<4x32xf32>, vector<4x32xf32>, vector<4x32xf32> -> vector<4x128xf32>
    %195 = vector.extract_strided_slice %44 {offsets = [0, 4, 0], sizes = [4, 1, 8], strides = [1, 1, 1]} : vector<4x8x8xf32> to vector<4x1x8xf32>
    %196 = vector.shape_cast %195 : vector<4x1x8xf32> to vector<4x8xf32>
    %197 = tpu.concatenate %190, %196 in 1 : vector<4x32xf32>, vector<4x8xf32> -> vector<4x40xf32>
    %c0_86 = arith.constant 0 : index
    %c0_87 = arith.constant 0 : index
    %198 = vector.load %arg19[%c0_86, %c0_87] : memref<40x32xf32, #tpu.memory_space<vmem>>, vector<40x32xf32>
    %cst_88 = arith.constant dense<0.000000e+00> : vector<4x32xf32>
    %199 = tpu.matmul %197, %198, %cst_88 {dimension_numbers = #tpu.dot_dimension_numbers<[1], [0], [0], [1], [0, 0, 1, 1], [], []>} : vector<4x40xf32>, vector<40x32xf32>, vector<4x32xf32> -> vector<4x32xf32>
    %c0_89 = arith.constant 0 : index
    %c0_90 = arith.constant 0 : index
    %200 = vector.load %arg20[%c0_89, %c0_90] : memref<1x32xf32, #tpu.memory_space<vmem>>, vector<1x32xf32>
    %201 = vector.broadcast %200 : vector<1x32xf32> to vector<4x32xf32>
    %202 = arith.addf %199, %201 : vector<4x32xf32>
    %cst_91 = arith.constant 0.000000e+00 : f32
    %203 = vector.broadcast %cst_91 : f32 to vector<4x32xf32>
    %204 = arith.maximumf %202, %203 : vector<4x32xf32>
    %c0_92 = arith.constant 0 : index
    %c0_93 = arith.constant 0 : index
    %205 = vector.load %arg21[%c0_92, %c0_93] : memref<32x64xf32, #tpu.memory_space<vmem>>, vector<32x64xf32>
    %cst_94 = arith.constant dense<0.000000e+00> : vector<4x64xf32>
    %206 = tpu.matmul %204, %205, %cst_94 {dimension_numbers = #tpu.dot_dimension_numbers<[1], [0], [0], [1], [0, 0, 1, 1], [], []>} : vector<4x32xf32>, vector<32x64xf32>, vector<4x64xf32> -> vector<4x64xf32>
    %c0_95 = arith.constant 0 : index
    %c0_96 = arith.constant 0 : index
    %207 = vector.load %arg22[%c0_95, %c0_96] : memref<1x64xf32, #tpu.memory_space<vmem>>, vector<1x64xf32>
    %208 = vector.broadcast %207 : vector<1x64xf32> to vector<4x64xf32>
    %209 = arith.addf %206, %208 : vector<4x64xf32>
    %210 = vector.extract_strided_slice %209 {offsets = [0, 0], sizes = [4, 32], strides = [1, 1]} : vector<4x64xf32> to vector<4x32xf32>
    %211 = vector.extract_strided_slice %209 {offsets = [0, 32], sizes = [4, 32], strides = [1, 1]} : vector<4x64xf32> to vector<4x32xf32>
    %212 = vector.extract_strided_slice %45 {offsets = [0, 5, 0], sizes = [4, 1, 32], strides = [1, 1, 1]} : vector<4x8x32xf32> to vector<4x1x32xf32>
    %213 = vector.shape_cast %212 : vector<4x1x32xf32> to vector<4x32xf32>
    %214 = vector.extract_strided_slice %46 {offsets = [0, 5, 0], sizes = [4, 1, 32], strides = [1, 1, 1]} : vector<4x8x32xf32> to vector<4x1x32xf32>
    %215 = vector.shape_cast %214 : vector<4x1x32xf32> to vector<4x32xf32>
    %216 = math.exp %211 : vector<4x32xf32>
    %cst_97 = arith.constant 9.99999993E-9 : f32
    %217 = vector.broadcast %cst_97 : f32 to vector<4x32xf32>
    %218 = arith.addf %216, %217 : vector<4x32xf32>
    %219 = tpu.reciprocal %218 {approx = true} : vector<4x32xf32> -> vector<4x32xf32>
    %220 = arith.mulf %210, %219 : vector<4x32xf32>
    %221 = arith.addf %213, %220 : vector<4x32xf32>
    %222 = arith.addf %215, %219 : vector<4x32xf32>
    %223 = tpu.reciprocal %222 {approx = true} : vector<4x32xf32> -> vector<4x32xf32>
    %224 = arith.mulf %221, %223 : vector<4x32xf32>
    %cst_98 = arith.constant 9.99999993E-9 : f32
    %225 = vector.broadcast %cst_98 : f32 to vector<4x32xf32>
    %226 = arith.addf %223, %225 : vector<4x32xf32>
    %227 = math.log %226 : vector<4x32xf32>
    %228 = tpu.concatenate %224, %227, %210, %211 in 1 : vector<4x32xf32>, vector<4x32xf32>, vector<4x32xf32>, vector<4x32xf32> -> vector<4x128xf32>
    %229 = vector.extract_strided_slice %44 {offsets = [0, 5, 0], sizes = [4, 1, 8], strides = [1, 1, 1]} : vector<4x8x8xf32> to vector<4x1x8xf32>
    %230 = vector.shape_cast %229 : vector<4x1x8xf32> to vector<4x8xf32>
    %231 = tpu.concatenate %224, %230 in 1 : vector<4x32xf32>, vector<4x8xf32> -> vector<4x40xf32>
    %c0_99 = arith.constant 0 : index
    %c0_100 = arith.constant 0 : index
    %232 = vector.load %arg19[%c0_99, %c0_100] : memref<40x32xf32, #tpu.memory_space<vmem>>, vector<40x32xf32>
    %cst_101 = arith.constant dense<0.000000e+00> : vector<4x32xf32>
    %233 = tpu.matmul %231, %232, %cst_101 {dimension_numbers = #tpu.dot_dimension_numbers<[1], [0], [0], [1], [0, 0, 1, 1], [], []>} : vector<4x40xf32>, vector<40x32xf32>, vector<4x32xf32> -> vector<4x32xf32>
    %c0_102 = arith.constant 0 : index
    %c0_103 = arith.constant 0 : index
    %234 = vector.load %arg20[%c0_102, %c0_103] : memref<1x32xf32, #tpu.memory_space<vmem>>, vector<1x32xf32>
    %235 = vector.broadcast %234 : vector<1x32xf32> to vector<4x32xf32>
    %236 = arith.addf %233, %235 : vector<4x32xf32>
    %cst_104 = arith.constant 0.000000e+00 : f32
    %237 = vector.broadcast %cst_104 : f32 to vector<4x32xf32>
    %238 = arith.maximumf %236, %237 : vector<4x32xf32>
    %c0_105 = arith.constant 0 : index
    %c0_106 = arith.constant 0 : index
    %239 = vector.load %arg21[%c0_105, %c0_106] : memref<32x64xf32, #tpu.memory_space<vmem>>, vector<32x64xf32>
    %cst_107 = arith.constant dense<0.000000e+00> : vector<4x64xf32>
    %240 = tpu.matmul %238, %239, %cst_107 {dimension_numbers = #tpu.dot_dimension_numbers<[1], [0], [0], [1], [0, 0, 1, 1], [], []>} : vector<4x32xf32>, vector<32x64xf32>, vector<4x64xf32> -> vector<4x64xf32>
    %c0_108 = arith.constant 0 : index
    %c0_109 = arith.constant 0 : index
    %241 = vector.load %arg22[%c0_108, %c0_109] : memref<1x64xf32, #tpu.memory_space<vmem>>, vector<1x64xf32>
    %242 = vector.broadcast %241 : vector<1x64xf32> to vector<4x64xf32>
    %243 = arith.addf %240, %242 : vector<4x64xf32>
    %244 = vector.extract_strided_slice %243 {offsets = [0, 0], sizes = [4, 32], strides = [1, 1]} : vector<4x64xf32> to vector<4x32xf32>
    %245 = vector.extract_strided_slice %243 {offsets = [0, 32], sizes = [4, 32], strides = [1, 1]} : vector<4x64xf32> to vector<4x32xf32>
    %246 = vector.extract_strided_slice %45 {offsets = [0, 6, 0], sizes = [4, 1, 32], strides = [1, 1, 1]} : vector<4x8x32xf32> to vector<4x1x32xf32>
    %247 = vector.shape_cast %246 : vector<4x1x32xf32> to vector<4x32xf32>
    %248 = vector.extract_strided_slice %46 {offsets = [0, 6, 0], sizes = [4, 1, 32], strides = [1, 1, 1]} : vector<4x8x32xf32> to vector<4x1x32xf32>
    %249 = vector.shape_cast %248 : vector<4x1x32xf32> to vector<4x32xf32>
    %250 = math.exp %245 : vector<4x32xf32>
    %cst_110 = arith.constant 9.99999993E-9 : f32
    %251 = vector.broadcast %cst_110 : f32 to vector<4x32xf32>
    %252 = arith.addf %250, %251 : vector<4x32xf32>
    %253 = tpu.reciprocal %252 {approx = true} : vector<4x32xf32> -> vector<4x32xf32>
    %254 = arith.mulf %244, %253 : vector<4x32xf32>
    %255 = arith.addf %247, %254 : vector<4x32xf32>
    %256 = arith.addf %249, %253 : vector<4x32xf32>
    %257 = tpu.reciprocal %256 {approx = true} : vector<4x32xf32> -> vector<4x32xf32>
    %258 = arith.mulf %255, %257 : vector<4x32xf32>
    %cst_111 = arith.constant 9.99999993E-9 : f32
    %259 = vector.broadcast %cst_111 : f32 to vector<4x32xf32>
    %260 = arith.addf %257, %259 : vector<4x32xf32>
    %261 = math.log %260 : vector<4x32xf32>
    %262 = tpu.concatenate %258, %261, %244, %245 in 1 : vector<4x32xf32>, vector<4x32xf32>, vector<4x32xf32>, vector<4x32xf32> -> vector<4x128xf32>
    %263 = vector.extract_strided_slice %44 {offsets = [0, 6, 0], sizes = [4, 1, 8], strides = [1, 1, 1]} : vector<4x8x8xf32> to vector<4x1x8xf32>
    %264 = vector.shape_cast %263 : vector<4x1x8xf32> to vector<4x8xf32>
    %265 = tpu.concatenate %258, %264 in 1 : vector<4x32xf32>, vector<4x8xf32> -> vector<4x40xf32>
    %c0_112 = arith.constant 0 : index
    %c0_113 = arith.constant 0 : index
    %266 = vector.load %arg19[%c0_112, %c0_113] : memref<40x32xf32, #tpu.memory_space<vmem>>, vector<40x32xf32>
    %cst_114 = arith.constant dense<0.000000e+00> : vector<4x32xf32>
    %267 = tpu.matmul %265, %266, %cst_114 {dimension_numbers = #tpu.dot_dimension_numbers<[1], [0], [0], [1], [0, 0, 1, 1], [], []>} : vector<4x40xf32>, vector<40x32xf32>, vector<4x32xf32> -> vector<4x32xf32>
    %c0_115 = arith.constant 0 : index
    %c0_116 = arith.constant 0 : index
    %268 = vector.load %arg20[%c0_115, %c0_116] : memref<1x32xf32, #tpu.memory_space<vmem>>, vector<1x32xf32>
    %269 = vector.broadcast %268 : vector<1x32xf32> to vector<4x32xf32>
    %270 = arith.addf %267, %269 : vector<4x32xf32>
    %cst_117 = arith.constant 0.000000e+00 : f32
    %271 = vector.broadcast %cst_117 : f32 to vector<4x32xf32>
    %272 = arith.maximumf %270, %271 : vector<4x32xf32>
    %c0_118 = arith.constant 0 : index
    %c0_119 = arith.constant 0 : index
    %273 = vector.load %arg21[%c0_118, %c0_119] : memref<32x64xf32, #tpu.memory_space<vmem>>, vector<32x64xf32>
    %cst_120 = arith.constant dense<0.000000e+00> : vector<4x64xf32>
    %274 = tpu.matmul %272, %273, %cst_120 {dimension_numbers = #tpu.dot_dimension_numbers<[1], [0], [0], [1], [0, 0, 1, 1], [], []>} : vector<4x32xf32>, vector<32x64xf32>, vector<4x64xf32> -> vector<4x64xf32>
    %c0_121 = arith.constant 0 : index
    %c0_122 = arith.constant 0 : index
    %275 = vector.load %arg22[%c0_121, %c0_122] : memref<1x64xf32, #tpu.memory_space<vmem>>, vector<1x64xf32>
    %276 = vector.broadcast %275 : vector<1x64xf32> to vector<4x64xf32>
    %277 = arith.addf %274, %276 : vector<4x64xf32>
    %278 = vector.extract_strided_slice %277 {offsets = [0, 0], sizes = [4, 32], strides = [1, 1]} : vector<4x64xf32> to vector<4x32xf32>
    %279 = vector.extract_strided_slice %277 {offsets = [0, 32], sizes = [4, 32], strides = [1, 1]} : vector<4x64xf32> to vector<4x32xf32>
    %280 = vector.extract_strided_slice %45 {offsets = [0, 7, 0], sizes = [4, 1, 32], strides = [1, 1, 1]} : vector<4x8x32xf32> to vector<4x1x32xf32>
    %281 = vector.shape_cast %280 : vector<4x1x32xf32> to vector<4x32xf32>
    %282 = vector.extract_strided_slice %46 {offsets = [0, 7, 0], sizes = [4, 1, 32], strides = [1, 1, 1]} : vector<4x8x32xf32> to vector<4x1x32xf32>
    %283 = vector.shape_cast %282 : vector<4x1x32xf32> to vector<4x32xf32>
    %284 = math.exp %279 : vector<4x32xf32>
    %cst_123 = arith.constant 9.99999993E-9 : f32
    %285 = vector.broadcast %cst_123 : f32 to vector<4x32xf32>
    %286 = arith.addf %284, %285 : vector<4x32xf32>
    %287 = tpu.reciprocal %286 {approx = true} : vector<4x32xf32> -> vector<4x32xf32>
    %288 = arith.mulf %278, %287 : vector<4x32xf32>
    %289 = arith.addf %281, %288 : vector<4x32xf32>
    %290 = arith.addf %283, %287 : vector<4x32xf32>
    %291 = tpu.reciprocal %290 {approx = true} : vector<4x32xf32> -> vector<4x32xf32>
    %292 = arith.mulf %289, %291 : vector<4x32xf32>
    %cst_124 = arith.constant 9.99999993E-9 : f32
    %293 = vector.broadcast %cst_124 : f32 to vector<4x32xf32>
    %294 = arith.addf %291, %293 : vector<4x32xf32>
    %295 = math.log %294 : vector<4x32xf32>
    %296 = tpu.concatenate %292, %295, %278, %279 in 1 : vector<4x32xf32>, vector<4x32xf32>, vector<4x32xf32>, vector<4x32xf32> -> vector<4x128xf32>
    %297 = vector.shape_cast %58 : vector<4x128xf32> to vector<4x1x128xf32>
    %298 = vector.shape_cast %92 : vector<4x128xf32> to vector<4x1x128xf32>
    %299 = vector.shape_cast %126 : vector<4x128xf32> to vector<4x1x128xf32>
    %300 = vector.shape_cast %160 : vector<4x128xf32> to vector<4x1x128xf32>
    %301 = vector.shape_cast %194 : vector<4x128xf32> to vector<4x1x128xf32>
    %302 = vector.shape_cast %228 : vector<4x128xf32> to vector<4x1x128xf32>
    %303 = vector.shape_cast %262 : vector<4x128xf32> to vector<4x1x128xf32>
    %304 = vector.shape_cast %296 : vector<4x128xf32> to vector<4x1x128xf32>
    %305 = tpu.concatenate %297, %298, %299, %300, %301, %302, %303, %304 in 1 : vector<4x1x128xf32>, vector<4x1x128xf32>, vector<4x1x128xf32>, vector<4x1x128xf32>, vector<4x1x128xf32>, vector<4x1x128xf32>, vector<4x1x128xf32>, vector<4x1x128xf32> -> vector<4x8x128xf32>
    %c0_125 = arith.constant 0 : index
    %c0_126 = arith.constant 0 : index
    %c0_127 = arith.constant 0 : index
    %306 = vector.load %arg24[%c0_125, %c0_126, %c0_127] : memref<4x8x128xf32, #tpu.memory_space<vmem>>, vector<4x8x128xf32>
    tpu.vector_store %arg24[%c0_125, %c0_126, %c0_127], %305 {strides = array<i32>} : memref<4x8x128xf32, #tpu.memory_space<vmem>>, vector<4x8x128xf32>,
    %307 = vector.extract_strided_slice %305 {offsets = [0, 0, 0], sizes = [4, 8, 32], strides = [1, 1, 1]} : vector<4x8x128xf32> to vector<4x8x32xf32>
    %308 = vector.shape_cast %307 : vector<4x8x32xf32> to vector<32x32xf32>
    %c0_128 = arith.constant 0 : index
    %c0_129 = arith.constant 0 : index
    %309 = vector.load %arg11[%c0_128, %c0_129] : memref<32x32xf32, #tpu.memory_space<vmem>>, vector<32x32xf32>
    %cst_130 = arith.constant dense<0.000000e+00> : vector<32x32xf32>
    %310 = tpu.matmul %308, %309, %cst_130 {dimension_numbers = #tpu.dot_dimension_numbers<[1], [0], [0], [1], [0, 0, 1, 1], [], []>} : vector<32x32xf32>, vector<32x32xf32>, vector<32x32xf32> -> vector<32x32xf32>
    %c0_131 = arith.constant 0 : index
    %c0_132 = arith.constant 0 : index
    %311 = vector.load %arg12[%c0_131, %c0_132] : memref<1x32xf32, #tpu.memory_space<vmem>>, vector<1x32xf32>
    %312 = vector.broadcast %311 : vector<1x32xf32> to vector<32x32xf32>
    %313 = arith.addf %310, %312 : vector<32x32xf32>
    %cst_133 = arith.constant 0.000000e+00 : f32
    %314 = vector.broadcast %cst_133 : f32 to vector<32x32xf32>
    %315 = arith.maximumf %313, %314 : vector<32x32xf32>
    %c0_134 = arith.constant 0 : index
    %c0_135 = arith.constant 0 : index
    %316 = vector.load %arg13[%c0_134, %c0_135] : memref<32x16xf32, #tpu.memory_space<vmem>>, vector<32x16xf32>
    %cst_136 = arith.constant dense<0.000000e+00> : vector<32x16xf32>
    %317 = tpu.matmul %315, %316, %cst_136 {dimension_numbers = #tpu.dot_dimension_numbers<[1], [0], [0], [1], [0, 0, 1, 1], [], []>} : vector<32x32xf32>, vector<32x16xf32>, vector<32x16xf32> -> vector<32x16xf32>
    %c0_137 = arith.constant 0 : index
    %c0_138 = arith.constant 0 : index
    %318 = vector.load %arg14[%c0_137, %c0_138] : memref<1x16xf32, #tpu.memory_space<vmem>>, vector<1x16xf32>
    %319 = vector.broadcast %318 : vector<1x16xf32> to vector<32x16xf32>
    %320 = arith.addf %317, %319 : vector<32x16xf32>
    %321 = arith.negf %320 : vector<32x16xf32>
    %322 = math.exp %321 : vector<32x16xf32>
    %cst_139 = arith.constant 1.000000e+00 : f32
    %323 = vector.broadcast %cst_139 : f32 to vector<32x16xf32>
    %324 = arith.addf %323, %322 : vector<32x16xf32>
    %325 = arith.divf %323, %324 : vector<32x16xf32>
    %c0_140 = arith.constant 0 : index
    %c0_141 = arith.constant 0 : index
    %326 = vector.load %arg25[%c0_140, %c0_141] : memref<32x16xf32, #tpu.memory_space<vmem>>, vector<32x16xf32>
    tpu.vector_store %arg25[%c0_140, %c0_141], %325 {strides = array<i32>} : memref<32x16xf32, #tpu.memory_space<vmem>>, vector<32x16xf32>,
    %c0_142 = arith.constant 0 : index
    %c0_143 = arith.constant 0 : index
    %327 = vector.load %arg15[%c0_142, %c0_143] : memref<32x32xf32, #tpu.memory_space<vmem>>, vector<32x32xf32>
    %cst_144 = arith.constant dense<0.000000e+00> : vector<32x32xf32>
    %328 = tpu.matmul %308, %327, %cst_144 {dimension_numbers = #tpu.dot_dimension_numbers<[1], [0], [0], [1], [0, 0, 1, 1], [], []>} : vector<32x32xf32>, vector<32x32xf32>, vector<32x32xf32> -> vector<32x32xf32>
    %c0_145 = arith.constant 0 : index
    %c0_146 = arith.constant 0 : index
    %329 = vector.load %arg16[%c0_145, %c0_146] : memref<1x32xf32, #tpu.memory_space<vmem>>, vector<1x32xf32>
    %330 = vector.broadcast %329 : vector<1x32xf32> to vector<32x32xf32>
    %331 = arith.addf %328, %330 : vector<32x32xf32>
    %cst_147 = arith.constant 0.000000e+00 : f32
    %332 = vector.broadcast %cst_147 : f32 to vector<32x32xf32>
    %333 = arith.maximumf %331, %332 : vector<32x32xf32>
    %c0_148 = arith.constant 0 : index
    %c0_149 = arith.constant 0 : index
    %334 = vector.load %arg17[%c0_148, %c0_149] : memref<32x24xf32, #tpu.memory_space<vmem>>, vector<32x24xf32>
    %cst_150 = arith.constant dense<0.000000e+00> : vector<32x24xf32>
    %335 = tpu.matmul %333, %334, %cst_150 {dimension_numbers = #tpu.dot_dimension_numbers<[1], [0], [0], [1], [0, 0, 1, 1], [], []>} : vector<32x32xf32>, vector<32x24xf32>, vector<32x24xf32> -> vector<32x24xf32>
    %c0_151 = arith.constant 0 : index
    %c0_152 = arith.constant 0 : index
    %336 = vector.load %arg18[%c0_151, %c0_152] : memref<1x24xf32, #tpu.memory_space<vmem>>, vector<1x24xf32>
    %337 = vector.broadcast %336 : vector<1x24xf32> to vector<32x24xf32>
    %338 = arith.addf %335, %337 : vector<32x24xf32>
    %c0_153 = arith.constant 0 : index
    %c0_154 = arith.constant 0 : index
    %339 = vector.load %arg26[%c0_153, %c0_154] : memref<32x24xf32, #tpu.memory_space<vmem>>, vector<32x24xf32>
    tpu.vector_store %arg26[%c0_153, %c0_154], %338 {strides = array<i32>} : memref<32x24xf32, #tpu.memory_space<vmem>>, vector<32x24xf32>,
    return
  }
}

</mosaic_0001>

<bundles_post_ra>
// kernel: tpu_custom_call.1
= control target key start
LH: loop header
LB: loop body
LE: loop exit
PB: predicated region body
PF: predicated region fallthrough
CT: control target
= control target key end

     0   :  { %s5607_s0 = inlined_call_operand.vmem [shape: f32[32,16], index: 0, kind: input, shape index: {}]   ;;  %s5608_s1 = inlined_call_operand.vmem [shape: f32[32,24], index: 1, kind: input, shape index: {}]   ;;  %s5609_s2 = inlined_call_operand.vmem [shape: f32[4,8,8], index: 2, kind: input, shape index: {}]   ;;  %s5610_s3 = inlined_call_operand.hbm [shape: f32[16,32], index: 3, kind: input, shape index: {}]   ;;  %s5611_s4 = inlined_call_operand.vmem [shape: f32[1,32], index: 4, kind: input, shape index: {}]   ;;  %s5612_s5 = inlined_call_operand.vmem [shape: f32[32,64], index: 5, kind: input, shape index: {}]   ;;  %s5613_s6 = inlined_call_operand.vmem [shape: f32[1,64], index: 6, kind: input, shape index: {}]   ;;  %s5614_s7 = inlined_call_operand.vmem [shape: f32[24,32], index: 7, kind: input, shape index: {}]   ;;  %s5615_s8 = inlined_call_operand.hbm [shape: f32[1,32], index: 8, kind: input, shape index: {}]   ;;  %s5616_s9 = inlined_call_operand.vmem [shape: f32[32,64], index: 9, kind: input, shape index: {}]   ;;  %s5617_s10 = inlined_call_operand.vmem [shape: f32[1,64], index: 10, kind: input, shape index: {}]   ;;  %s5618_s11 = inlined_call_operand.vmem [shape: f32[32,32], index: 11, kind: input, shape index: {}]   ;;  %s5619_s12 = inlined_call_operand.vmem [shape: f32[1,32], index: 12, kind: input, shape index: {}]   ;;  %s5620_s13 = inlined_call_operand.vmem [shape: f32[32,16], index: 13, kind: input, shape index: {}]   ;;  %s5621_s14 = inlined_call_operand.vmem [shape: f32[1,16], index: 14, kind: input, shape index: {}]   ;;  %s5622_s15 = inlined_call_operand.vmem [shape: f32[32,32], index: 15, kind: input, shape index: {}]   ;;  %s5623_s16 = inlined_call_operand.vmem [shape: f32[1,32], index: 16, kind: input, shape index: {}]   ;;  %s5624_s17 = inlined_call_operand.vmem [shape: f32[32,24], index: 17, kind: input, shape index: {}]   ;;  %s5625_s18 = inlined_call_operand.vmem [shape: f32[1,24], index: 18, kind: input, shape index: {}]   ;;  %s5626_s19 = inlined_call_operand.vmem [shape: f32[40,32], index: 19, kind: input, shape index: {}]   ;;  %s5627_s20 = inlined_call_operand.vmem [shape: f32[1,32], index: 20, kind: input, shape index: {}]   ;;  %s5628_s21 = inlined_call_operand.vmem [shape: f32[32,64], index: 21, kind: input, shape index: {}]   ;;  %s5629_s22 = inlined_call_operand.vmem [shape: f32[1,64], index: 22, kind: input, shape index: {}]   ;;  %s5630_s23 = inlined_call_operand.hbm [shape: f32[32,128], index: 23, kind: output, shape index: {0}]   ;;  %s5631_s24 = inlined_call_operand.hbm [shape: f32[4,8,128], index: 24, kind: output, shape index: {1}]   ;;  %s5632_s25 = inlined_call_operand.vmem [shape: f32[32,16], index: 25, kind: output, shape index: {2}]   ;;  %s5633_s26 = inlined_call_operand.vmem [shape: f32[32,24], index: 26, kind: output, shape index: {3}]  }
   0x1   :  { %5644 = sst [smem:[#allocation14_spill]] %s5607_s0 }
   0x2   :  { %5645 = sst [smem:[#allocation15_spill]] %s5608_s1 }
   0x3   :  { %5646 = sst [smem:[#allocation16_spill]] %s5609_s2 }
   0x4   :  { %5647 = sst [smem:[#allocation17_spill]] %s5610_s3 }
   0x5   :  { %5648 = sst [smem:[#allocation18_spill]] %s5611_s4 }
   0x6   :  { %5649 = sst [smem:[#allocation19_spill]] %s5612_s5 }
   0x7   :  { %5650 = sst [smem:[#allocation20_spill]] %s5613_s6 }
   0x8   :  { %5651 = sst [smem:[#allocation21_spill]] %s5614_s7 }
   0x9   :  { %5652 = sst [smem:[#allocation22_spill]] %s5615_s8 }
   0xa   :  { %5653 = sst [smem:[#allocation23_spill]] %s5616_s9 }
   0xb   :  { %5654 = sst [smem:[#allocation24_spill]] %s5617_s10 }
   0xc   :  { %5655 = sst [smem:[#allocation25_spill]] %s5632_s25 }
   0xd   :  { %5656 = sst [smem:[#allocation26_spill]] %s5633_s26 }
   0xe   :  { %32 = vsyncpa [#allocation3], 0 }
   0xf   :  { %33 = vsyncpa [#allocation6], 0 }
  0x10   :  { %34 = vsyncpa [#allocation4], 0 }
  0x11   :  { %35 = vsyncpa [#allocation9], 0  ;;  %s4488_s27 = smov [#allocation2]   ;;  %s5657_s8 = sld [smem:[#allocation17_spill]] }
  0x12   :  { %s47_s3 = sshll.u32 %s4488_s27, 4  ;;  %s48_s3 = int_to_ptr.vmem [resolvable:$true] %s47_s3 }
  0x17   :  { %s4392_s4 = scalar_lea.hbm %s5657_s8, 256 }
  0x18   :  { %p4393_p0 = scmp.ne.s32.totalorder %s5657_s8, %s4392_s4  ;;  %p4396_p1 = scmp.lt.u32.totalorder %s4392_s4, %s5657_s8 }
  0x1a   :  { %p4398_p2 = pnand %p4396_p1, %p4393_p0 }
  0x1c   :  { %4401 = shalt.err (!%p4398_p2)
}
  0x1d   :  { %s4402_s2 = scalar_lea.vmem %s48_s3, 256  ;;  %p4407_p4 = scmp.lt.s32.totalorder %s48_s3, %s48_s3 }
  0x1e   :  { %p4403_p3 = scmp.ne.s32.totalorder %s48_s3, %s4402_s2  ;;  %p4408_p5 = scmp.lt.s32.totalorder %s4402_s2, %s4402_s2 }
  0x20   :  { %p4409_p6 = por %p4408_p5, %p4407_p4 }
  0x22   :  { %p4410_p7 = pnand %p4409_p6, %p4403_p3 }
  0x24   :  { %4413 = shalt.err (!%p4410_p7)
}
  0x25   :  { %s4489_s5 = smov 128   ;;  %s4490_s10 = smov 8  }
  0x26   :  { %53 = dma.hbm_to_vmem [thread:$0]  %s5657_s8, 256, %s48_s3, [#allocation3], %s4489_s5, %s4489_s5, %s4490_s10  }
  0x27   :  { %s4491_s27 = smov [#allocation5]   ;;  %s5658_s29 = sld [smem:[#allocation22_spill]] }
  0x28   :  { %s68_s7 = sshll.u32 %s4491_s27, 4  ;;  %s69_s7 = int_to_ptr.vmem [resolvable:$true] %s68_s7 }
  0x2d   :  { %s4414_s0 = scalar_lea.hbm %s5658_s29, 16 }
  0x2e   :  { %p4415_p8 = scmp.ne.s32.totalorder %s5658_s29, %s4414_s0  ;;  %p4418_p9 = scmp.lt.u32.totalorder %s4414_s0, %s5658_s29 }
  0x30   :  { %p4420_p10 = pnand %p4418_p9, %p4415_p8 }
  0x32   :  { %4423 = shalt.err (!%p4420_p10)
}
  0x33   :  { %s4424_s26 = scalar_lea.vmem %s69_s7, 16  ;;  %s4428_s3 = scalar_lea.vmem %s69_s7, 32 }
  0x34   :  { %p4425_p11 = scmp.ne.s32.totalorder %s69_s7, %s4424_s26  ;;  %p4429_p12 = scmp.lt.s32.totalorder %s69_s7, %s69_s7 }
  0x35   :  { %p4430_p13 = scmp.lt.s32.totalorder %s4428_s3, %s4424_s26 }
  0x37   :  { %p4431_p0 = por %p4430_p13, %p4429_p12 }
  0x39   :  { %p4432_p1 = pnand %p4431_p0, %p4425_p11 }
  0x3b   :  { %4435 = shalt.err (!%p4432_p1)
}
  0x3c   :  { %71 = dma.hbm_to_vmem [thread:$0]  %s5658_s29, 16, %s69_s7, [#allocation6]  }
  0x3d   :  { %4480 = dma.done.wait [#allocation3], 256  }
  0x3e   :  { %4481 = vsyncadd [#allocation3], 4294967040 }
  0x3f   :  { %4482 = dma.done.wait [#allocation6], 16  }
  0x40   :  { %4483 = vsyncadd [#allocation6], 4294967280  ;;  %vm119_vm0 = vcmask 130048   ;;  %v110_v0 = vld [vmem:[#allocation2] sm:$0xff]  ;;  %v111_v1 = vld [vmem:[#allocation2 + $0x8] sm:$0xff]  ;;  %s5659_s27 = sld [smem:[#allocation14_spill]] }
  0x41   :  { %v4031_v3 = vpack.c.bf16 %v111_v1, %v110_v0  ;;  %s5660_s4 = sld [smem:[#allocation21_spill]]  ;;  %s5661_s3 = sld [smem:[#allocation19_spill]]  ;;  %vm380_vm1 = vcmask 195584   ;;  %vm232_vm2 = vcmask 261120   ;;  %v3569_v38 = vld [vmem:[#allocation5] ss:$0 sm:$0xff] }
  0x42   :  { %s5662_s30 = sld [smem:[#allocation15_spill]]  ;;  %s5664_s6 = sld [smem:[#allocation18_spill]]  ;;  %vm704_vm3 = vcmask 1041409   ;;  %vm707_vm4 = vcmask 1042434   ;;  %vm710_vm5 = vcmask 1043459   ;;  %vm4495_vm6 = vmmov 0  }
  0x43   :  { %4032 = vmatprep.subr.bf16.mxu0 %v4031_v3  ;;  %s5663_s9 = sld [smem:[#allocation23_spill]]  ;;  %s5665_s0 = sld [smem:[#allocation20_spill]]  ;;  %vm754_vm7 = vcmask 326656   ;;  %vm990_vm8 = vcmask 1044484   ;;  %vm1244_vm9 = vcmask 1045509   ;;  %vm1498_vm10 = vcmask 1046534  }
  0x44   :  { %4034 = vmatpush3.bf16.msra.mxu0 %v4031_v3  ;;  %s5667_s8 = sld [smem:[#allocation16_spill]]  ;;  %s4496_s25 = smov 32   ;;  %vm1754_vm11 = vcmask 1047559   ;;  %vm2046_vm12 = vcmask 1042432   ;;  %vm650_vm13 = vcmask 523264   ;;  %vm726_vm14 = vcmask 785408  }
  0x45   :  { %vm2311_vm15 = vcmask 1041408  }
  0x46   :  { %v106_v2 = vld [vmem:[%s5659_s27] sm:$0xff]  ;;  %v107_v7 = vld [vmem:[%s5659_s27 + $0x8] sm:$0xff]  ;;  %v108_v10 = vld [vmem:[%s5659_s27 + $0x10] sm:$0xff] }
  0x47   :  { %3761 = vmatprep.mubr.msk.f32.mxu0 %vm119_vm0, %v106_v2  ;;  %v370_v4 = vld [vmem:[%s5660_s4] sm:$0xff]  ;;  %v371_v5 = vld [vmem:[%s5660_s4 + $0x8] sm:$0xff]  ;;  %v372_v12 = vld [vmem:[%s5660_s4 + $0x10] sm:$0xff]  ;;  %s4492_s4 = smov 96  }
  0x48   :  { %v4043_v6 = vpack.c.bf16 %v371_v5, %v370_v4  ;;  %v221_v8 = vld [vmem:[%s5661_s3] sm:$0xff]  ;;  %v222_v9 = vld [vmem:[%s5661_s3 + $0x8] sm:$0xff]  ;;  %3762 = vmatmul.mubr.msk.f32.vlgmr.msra.gmra.mrb[0].mxu0 %vm119_vm0, %v107_v7  ;;  %v109_v13 = vld [vmem:[%s5659_s27 + $0x18] sm:$0xff] }
  0x49   :  { %v4035_v11 = vpack.c.bf16 %v222_v9, %v221_v8  ;;  %3764 = vmatprep.mubr.msk.f32.mxu0 %vm119_vm0, %v108_v10  ;;  %v366_v14 = vld [vmem:[%s5662_s30] sm:$0xff]  ;;  %v367_v15 = vld [vmem:[%s5662_s30 + $0x8] sm:$0xff]  ;;  %v368_v16 = vld [vmem:[%s5662_s30 + $0x10] sm:$0xff] }
  0x4a   :  { %4044 = vmatprep.subr.bf16.mxu0 %v4043_v6  ;;  %v369_v17 = vld [vmem:[%s5662_s30 + $0x18] sm:$0xff]  ;;  %v223_v18 = vld [vmem:[%s5661_s3 + $0x10] sm:$0xff]  ;;  %v482_v21 = vld [vmem:[%s5663_s9] sm:$0xff] }
  0x4b   :  { %4036 = vmatprep.subr.bf16.mxu1 %v4035_v11  ;;  %4046 = vmatpush3.bf16.msra.mxu0 %v4043_v6  ;;  %v224_v19 = vld [vmem:[%s5661_s3 + $0x18] sm:$0xff]  ;;  %v483_v22 = vld [vmem:[%s5663_s9 + $0x8] sm:$0xff]  ;;  %v3559_v24 = vld [vmem:[%s5664_s6] ss:$0 sm:$0xff] }
  0x4c   :  { %3785 = vmatprep.subr.mxu0 %v372_v12  ;;  %4038 = vmatpush3.bf16.msra.mxu1 %v4035_v11  ;;  %v4039_v20 = vpack.c.bf16 %v224_v19, %v223_v18  ;;  %v4047_v23 = vpack.c.bf16 %v483_v22, %v482_v21  ;;  %v484_v29 = vld [vmem:[%s5663_s9 + $0x10] sm:$0xff]  ;;  %v485_v30 = vld [vmem:[%s5663_s9 + $0x18] sm:$0xff]  ;;  %v3564_v53 = vld [vmem:[%s5665_s0] ss:$0 sm:$0xff]  ;;  %s5666_s9 = sld [smem:[#allocation24_spill]] }
  0x4d   :  { %3765 = vmatmul.mubr.msk.f32.gmra.mrb[2].mxu0 %vm119_vm0, %v109_v13  ;;  %v4051_v36 = vpack.c.bf16 %v485_v30, %v484_v29 }
  0x4e   :  { %3787 = vmatprep.mubr.msk.f32.mxu0 %vm380_vm1, %v366_v14  ;;  %4040 = vmatprep.subr.bf16.mxu1 %v4039_v20 }
  0x4f   :  { %3786 = vmatpush3.msra.mxu0 %v372_v12 }
  0x50   :  { %4042 = vmatpush3.bf16.msra.mxu1 %v4039_v20 }
  0x51   :  { %3788 = vmatmul.mubr.msk.f32.vlgmr.msra.gmra.mrb[4].mxu0 %vm380_vm1, %v367_v15  ;;  %4048 = vmatprep.subr.bf16.mxu1 %v4047_v23 }
  0x52   :  { %3790 = vmatprep.mubr.msk.f32.mxu0 %vm380_vm1, %v368_v16  ;;  %v3574_v0 = vld [vmem:[%s5666_s9] ss:$0 sm:$0xff] }
  0x55   :  { %3791 = vmatmul.mubr.msk.f32.gmra.mrb[6].mxu0 %vm380_vm1, %v369_v17 }
 0x11b   :  { %v3763_v25 = vpop.f32.mrb[0].mxu0 }
 0x11c   :  { %v204_v26 = vadd.f32 %v3763_v25, %v3559_v24  ;;  %v198_v27 = vpop.f32.mrb[1].mxu0 }
 0x11d   :  { %v199_v28 = vadd.f32 %v3559_v24, %v198_v27 }
 0x11e   :  { %v218_v33 = vmax.f32 %v204_v26, 0.0 }
 0x11f   :  { %v217_v31 = vmax.f32 %v199_v28, 0.0 }
 0x120   :  { %v3766_v32 = vpop.f32.mrb[2].mxu0 }
 0x121   :  { %v214_v34 = vadd.f32 %v3766_v32, %v3559_v24  ;;  %v208_v35 = vpop.f32.mrb[3].mxu0  ;;  %3775 = vmatprep.mubr.msk.f32.mxu1 %vm232_vm2, %v217_v31 }
 0x122   :  { %v209_v37 = vadd.f32 %v3559_v24, %v208_v35  ;;  %3776 = vmatmul.mubr.msk.f32.vlgmr.msra.gmra.mrb[0].mxu1 %vm232_vm2, %v218_v33 }
 0x123   :  { %4050 = vmatpush3.bf16.msra.mxu1 %v4047_v23  ;;  %v220_v41 = vmax.f32 %v214_v34, 0.0 }
 0x124   :  { %v219_v39 = vmax.f32 %v209_v37, 0.0  ;;  %v3789_v40 = vpop.f32.mrb[4].mxu0  ;;  %4052 = vmatprep.subr.bf16.mxu1 %v4051_v36 }
 0x125   :  { %v465_v42 = vadd.f32 %v3789_v40, %v3569_v38  ;;  %v459_v43 = vpop.f32.mrb[5].mxu0 }
 0x126   :  { %v460_v44 = vadd.f32 %v3569_v38, %v459_v43  ;;  %3778 = vmatprep.mubr.msk.f32.mxu1 %vm232_vm2, %v219_v39  ;;  %v743_v43 = vld [vmem:[%s5626_s19 + $0x8] sm:$0xff] }
 0x127   :  { %3779 = vmatmul.mubr.msk.f32.gmra.mrb[2].mxu1 %vm232_vm2, %v220_v41  ;;  %v479_v47 = vmax.f32 %v465_v42, 0.0  ;;  %v660_v41 = vld [vmem:[%s5667_s8 + $0x8] sm:$0xff]  ;;  %v742_v42 = vld [vmem:[%s5626_s19] sm:$0xff] }
 0x128   :  { %v478_v45 = vmax.f32 %v460_v44, 0.0  ;;  %v3792_v46 = vpop.f32.mrb[6].mxu0  ;;  %4054 = vmatpush3.bf16.msra.mxu1 %v4051_v36 }
 0x129   :  { %v475_v48 = vadd.f32 %v3792_v46, %v3569_v38  ;;  %v469_v49 = vpop.f32.mrb[7].mxu0 }
 0x12a   :  { %v470_v50 = vadd.f32 %v3569_v38, %v469_v49  ;;  %3801 = vmatprep.mubr.msk.f32.mxu1 %vm232_vm2, %v478_v45  ;;  %v4794_v45 = vpack.c.bf16 %v743_v43, %v742_v42  ;;  %v4804_v49 = vrot.slane %v660_v41, 7 }
 0x12b   :  { %3802 = vmatmul.mubr.msk.f32.vlgmr.msra.gmra.mrb[4].mxu1 %vm232_vm2, %v479_v47  ;;  %v481_v52 = vmax.f32 %v475_v48, 0.0  ;;  %v4493_v47 = vmov 0.0|0.0   ;;  %v661_v48 = vld [vmem:[%s5667_s8 + $0x10] sm:$0xff] }
 0x12c   :  { %v480_v51 = vmax.f32 %v470_v50, 0.0  ;;  %4055 = vmatprep.subr.bf16.mxu0 %v4493_v47  ;;  %4061 = vmatprep.subr.bf16.mxu1 %v4493_v47  ;;  %v4811_v50 = vld [vmem:[%s5667_s8] sm:$0xff] }
 0x12d   :  { %4057 = vmatpush3.bf16.msra.mxu0 %v4794_v45 }
 0x12e   :  { %3804 = vmatprep.mubr.msk.f32.mxu1 %vm232_vm2, %v480_v51  ;;  %4058 = vmatprep.subr.bf16.mxu0 %v4493_v47  ;;  %v744_v51 = vld [vmem:[%s5626_s19 + $0x10] sm:$0xff] }
 0x12f   :  { %3805 = vmatmul.mubr.msk.f32.gmra.mrb[6].mxu1 %vm232_vm2, %v481_v52  ;;  %v745_v52 = vld [vmem:[%s5626_s19 + $0x18] sm:$0xff] }
 0x1f5   :  { %v3777_v54 = vpop.f32.mrb[0].mxu1 }
 0x1f6   :  { %v4742_v55 = vadd.f32 %v3777_v54, %v3564_v53  ;;  %v311_v56 = vpop.f32.mrb[1].mxu1  ;;  %v662_v54 = vld [vmem:[%s5667_s8 + $0x18] sm:$0xff] }
 0x1f7   :  { %v4744_v57 = vadd.f32 %v3564_v53, %v311_v56  ;;  %v4825_v56 = vrot.slane %v661_v48, 6 }
 0x1f8   :  { %v332_v58 = vmul.f32 1.442695, %v4742_v55 }
 0x1f9   :  { %v330_v59 = vmul.f32 1.442695, %v4744_v57 }
 0x1fa   :  { %v3780_v60 = vpop.f32.mrb[2].mxu1  ;;  %4184 = vpow2.f32 %v332_v58 }
 0x1fb   :  { %v4748_v61 = vadd.f32 %v3780_v60, %v3564_v53  ;;  %v321_v62 = vpop.f32.mrb[3].mxu1  ;;  %4186 = vpow2.f32 %v330_v59  ;;  %v733_v59 = vsel %vm704_vm3, %v4804_v49, %v4811_v50 }
 0x1fc   :  { %v4750_v63 = vadd.f32 %v3564_v53, %v321_v62  ;;  %v4820_v53 = vpack.c.bf16 %v745_v52, %v744_v51 }
 0x1fd   :  { %v336_v1 = vmul.f32 1.442695, %v4748_v61 }
 0x1fe   :  { %v334_v2 = vmul.f32 1.442695, %v4750_v63  ;;  %v3803_v3 = vpop.f32.mrb[4].mxu1  ;;  %4060 = vmatpush3.bf16.msra.mxu0 %v4820_v53 }
 0x1ff   :  { %4188 = vpow2.f32 %v336_v1  ;;  %v4757_v4 = vadd.f32 %v3803_v3, %v3574_v0  ;;  %v571_v5 = vpop.f32.mrb[5].mxu1  ;;  %v4494_v1 = vmov 0.0   ;;  %v735_v3 = vsel %vm707_vm4, %v4825_v56, %v733_v59 }
 0x200   :  { %4190 = vpow2.f32 %v334_v2  ;;  %v4759_v6 = vadd.f32 %v3574_v0, %v571_v5  ;;  %3815 = vmatprep.subr.mxu0 %v4494_v1  ;;  %v4840_v5 = vld [vmem:[%s5626_s19 + $0x20] sm:$0xff]  ;;  %3817 = vmatprep.mubr.msk.f32.mxu0 %vm4495_vm6, %v4494_v1 }
 0x201   :  { %v592_v7 = vmul.f32 1.442695, %v4757_v4  ;;  %3828 = vmatprep.mubr.msk.f32.mxu1 %vm4495_vm6, %v4494_v1 }
 0x202   :  { %v590_v8 = vmul.f32 1.442695, %v4759_v6  ;;  %v3806_v9 = vpop.f32.mrb[6].mxu1  ;;  %3816 = vmatpush3.msra.mxu0 %v4840_v5 }
 0x203   :  { %4192 = vpow2.f32 %v592_v7  ;;  %v4763_v10 = vadd.f32 %v3806_v9, %v3574_v0  ;;  %v581_v11 = vpop.f32.mrb[7].mxu1  ;;  %4067 = vmatprep.subr.bf16.mxu0 %v4493_v47 }
 0x204   :  { %4194 = vpow2.f32 %v590_v8  ;;  %v4765_v12 = vadd.f32 %v3574_v0, %v581_v11  ;;  %v4185_v13 = vpop.eup %4184  ;;  %v4832_v0 = vrot.slane %v662_v54, 5 }
 0x205   :  { %v596_v14 = vmul.f32 1.442695, %v4763_v10  ;;  %v4187_v15 = vpop.eup %4186  ;;  %v339_v16 = vadd.f32 1e-08, %v4185_v13 }
 0x206   :  { %v594_v17 = vmul.f32 1.442695, %v4765_v12  ;;  %v338_v18 = vadd.f32 1e-08, %v4187_v15  ;;  %v737_v9 = vsel %vm710_vm5, %v4832_v0, %v735_v3  ;;  %v829_v15 = vld [vmem:[%s5628_s21] sm:$0xff] }
 0x207   :  { %4196 = vpow2.f32 %v596_v14 }
 0x208   :  { %4198 = vrcp.f32 %v339_v16  ;;  %v830_v16 = vld [vmem:[%s5628_s21 + $0x8] sm:$0xff] }
 0x209   :  { %v4189_v19 = vpop.eup %4188  ;;  %4200 = vpow2.f32 %v594_v17 }
 0x20a   :  { %v4191_v20 = vpop.eup %4190  ;;  %v341_v21 = vadd.f32 1e-08, %v4189_v19  ;;  %4202 = vrcp.f32 %v338_v18  ;;  %v4860_v19 = vpack.c.bf16 %v830_v16, %v829_v15 }
 0x20b   :  { %v340_v22 = vadd.f32 1e-08, %v4191_v20 }
 0x20c   :  { %4204 = vrcp.f32 %v341_v21  ;;  %4063 = vmatpush3.bf16.msra.mxu1 %v4860_v19 }
 0x20d   :  { %v4193_v23 = vpop.eup %4192  ;;  %4206 = vrcp.f32 %v340_v22  ;;  %4064 = vmatprep.subr.bf16.mxu1 %v4493_v47 }
 0x20e   :  { %v4195_v24 = vpop.eup %4194  ;;  %v599_v25 = vadd.f32 1e-08, %v4193_v23 }
 0x20f   :  { %v598_v26 = vadd.f32 1e-08, %v4195_v24 }
 0x210   :  { %4208 = vrcp.f32 %v599_v25 }
 0x211   :  { %v4197_v27 = vpop.eup %4196  ;;  %4210 = vrcp.f32 %v598_v26 }
 0x212   :  { %v4199_v28 = vpop.eup %4198  ;;  %v601_v29 = vadd.f32 1e-08, %v4197_v27 }
 0x213   :  { %352 = vrot.lane.b32.xlu0 %v4199_v28, %s4492_s4  ;;  %v4201_v30 = vpop.eup %4200 }
 0x214   :  { %4212 = vrcp.f32 %v601_v29  ;;  %v4203_v31 = vpop.eup %4202  ;;  %v600_v32 = vadd.f32 1e-08, %v4201_v30 }
 0x216   :  { %v4205_v33 = vpop.eup %4204  ;;  %4214 = vrcp.f32 %v600_v32 }
 0x217   :  { %356 = vrot.lane.b32.xlu1 %v4205_v33, %s4492_s4  ;;  %350 = vrot.lane.b32.xlu0 %v4203_v31, %s4492_s4  ;;  %v4207_v34 = vpop.eup %4206 }
 0x21a   :  { %v4209_v35 = vpop.eup %4208 }
 0x21b   :  { %v4211_v36 = vpop.eup %4210  ;;  %v4772_v37 = vadd.f32 %v4209_v35, %v4199_v28  ;;  %354 = vrot.lane.b32.xlu1 %v4207_v34, %s4492_s4  ;;  %612 = vrot.lane.b32.xlu0 %v4209_v35, %s4492_s4 }
 0x21c   :  { %v4776_v38 = vadd.f32 %v4211_v36, %v4203_v31 }
 0x21d   :  { %4216 = vrcp.f32 %v4772_v37 }
 0x21e   :  { %v4213_v39 = vpop.eup %4212  ;;  %4218 = vrcp.f32 %v4776_v38 }
 0x21f   :  { %v4780_v40 = vadd.f32 %v4213_v39, %v4205_v33  ;;  %616 = vrot.lane.b32.xlu1 %v4213_v39, %s4492_s4  ;;  %610 = vrot.lane.b32.xlu0 %v4211_v36, %s4492_s4 }
 0x220   :  { %v4215_v44 = vpop.eup %4214 }
 0x221   :  { %4220 = vrcp.f32 %v4780_v40  ;;  %v4796_v46 = vadd.f32 %v4215_v44, %v4207_v34 }
 0x223   :  { %614 = vrot.lane.b32.xlu1 %v4215_v44, %s4492_s4  ;;  %4222 = vrcp.f32 %v4796_v46 }
 0x227   :  { %v4217_v58 = vpop.eup %4216 }
 0x228   :  { %v4219_v60 = vpop.eup %4218  ;;  %673 = vrot.lane.b32.xlu0 %v4217_v58, %s4492_s4  ;;  %v688_v62 = vadd.f32 1e-08, %v4217_v58 }
 0x229   :  { %v687_v2 = vadd.f32 1e-08, %v4219_v60 }
 0x22a   :  { %4224 = vlog2.f32 %v688_v62 }
 0x22b   :  { %v4221_v7 = vpop.eup %4220  ;;  %4226 = vlog2.f32 %v687_v2 }
 0x22c   :  { %671 = vrot.lane.b32.xlu0 %v4219_v60, %s4492_s4  ;;  %v690_v8 = vadd.f32 1e-08, %v4221_v7 }
 0x22d   :  { %v4223_v11 = vpop.eup %4222 }
 0x22e   :  { %4228 = vlog2.f32 %v690_v8  ;;  %675 = vrot.lane.b32.xlu1 %v4223_v11, %s4492_s4  ;;  %v689_v13 = vadd.f32 1e-08, %v4223_v11 }
 0x230   :  { %738 = vrot.lane.b32.xlu0 %v737_v9, %s4496_s25  ;;  %4230 = vlog2.f32 %v689_v13 }
 0x232   :  { %677 = vrot.lane.b32.xlu1 %v4221_v7, %s4492_s4 }
 0x234   :  { %v4225_v14 = vpop.eup %4224 }
 0x235   :  { %v4227_v17 = vpop.eup %4226  ;;  %v694_v18 = vmul.f32 0.6931472, %v4225_v14 }
 0x236   :  { %v692_v20 = vmul.f32 0.6931472, %v4227_v17 }
 0x237   :  { %v717_v21 = vrot.slane %v694_v18, 7 }
 0x238   :  { %v4229_v22 = vpop.eup %4228 }
 0x239   :  { %v718_v23 = vsel %vm704_vm3, %v717_v21, %v692_v20  ;;  %v698_v25 = vmul.f32 0.6931472, %v4229_v22 }
 0x23a   :  { %v4231_v24 = vpop.eup %4230 }
 0x23b   :  { %v696_v26 = vmul.f32 0.6931472, %v4231_v24  ;;  %v721_v28 = vrot.slane %v698_v25, 5 }
 0x23d   :  { %v719_v27 = vrot.slane %v696_v26, 6  ;;  %v831_v26 = vld [vmem:[%s5628_s21 + $0x10] sm:$0xff] }
 0x23f   :  { %v720_v29 = vsel %vm707_vm4, %v719_v27, %v718_v23  ;;  %v832_v27 = vld [vmem:[%s5628_s21 + $0x18] sm:$0xff] }
 0x240   :  { %v722_v30 = vsel %vm710_vm5, %v721_v28, %v720_v29  ;;  %v4909_v28 = vpack.c.bf16 %v832_v27, %v831_v26  ;;  %v4916_v29 = vld [vmem:[%s5627_s20] ss:$0 sm:$0xff] }
 0x242   :  { %4066 = vmatpush3.bf16.msra.mxu1 %v4909_v28 }
 0x243   :  { %4073 = vmatprep.subr.bf16.mxu1 %v4493_v47 }
 0x285   :  { %v353_v31 = vpop.permute.xlu0 %352 }
 0x286   :  { %v363_v48 = vmul.f32 %v353_v31, %v4742_v55 }
 0x289   :  { %v357_v32 = vpop.permute.xlu1 %356  ;;  %v351_v33 = vpop.permute.xlu0 %350 }
 0x28a   :  { %v362_v54 = vmul.f32 %v351_v33, %v4744_v57  ;;  %v365_v3 = vmul.f32 %v357_v32, %v4748_v61 }
 0x28d   :  { %v355_v34 = vpop.permute.xlu1 %354  ;;  %v613_v35 = vpop.permute.xlu0 %612 }
 0x28e   :  { %v623_v43 = vmul.f32 %v613_v35, %v4757_v4  ;;  %v364_v51 = vmul.f32 %v355_v34, %v4750_v63  ;;  %v4929_v34 = vld [vmem:[%s5629_s22] ss:$0 sm:$0xff] }
 0x290   :  { %v4873_v58 = vadd.f32 %v623_v43, %v363_v48 }
 0x291   :  { %v617_v36 = vpop.permute.xlu1 %616  ;;  %v611_v39 = vpop.permute.xlu0 %610 }
 0x292   :  { %v622_v52 = vmul.f32 %v611_v39, %v4759_v6  ;;  %v625_v59 = vmul.f32 %v617_v36, %v4763_v10 }
 0x294   :  { %v4879_v7 = vadd.f32 %v622_v52, %v362_v54  ;;  %v4883_v11 = vadd.f32 %v625_v59, %v365_v3 }
 0x295   :  { %v615_v41 = vpop.permute.xlu1 %614 }
 0x296   :  { %v624_v44 = vmul.f32 %v615_v41, %v4765_v12 }
 0x298   :  { %v4876_v60 = vadd.f32 %v624_v44, %v364_v51 }
 0x29a   :  { %v674_v42 = vpop.permute.xlu0 %673 }
 0x29b   :  { %v684_v8 = vmul.f32 %v674_v42, %v4873_v58 }
 0x29d   :  { %v703_v16 = vrot.slane %v684_v8, 7  ;;  %v1012_v8 = vsel %vm707_vm4, %v4804_v49, %v4811_v50 }
 0x29e   :  { %v672_v62 = vpop.permute.xlu0 %671 }
 0x29f   :  { %v683_v13 = vmul.f32 %v672_v62, %v4879_v7 }
 0x2a0   :  { %v676_v2 = vpop.permute.xlu1 %675 }
 0x2a1   :  { %v685_v9 = vmul.f32 %v676_v2, %v4876_v60  ;;  %v705_v18 = vsel %vm704_vm3, %v703_v16, %v683_v13 }
 0x2a2   :  { %v739_v21 = vpop.permute.xlu0 %738 }
 0x2a3   :  { %v706_v14 = vrot.slane %v685_v9, 6 }
 0x2a4   :  { %v678_v15 = vpop.permute.xlu1 %677 }
 0x2a5   :  { %v686_v17 = vmul.f32 %v678_v15, %v4883_v11  ;;  %v708_v22 = vsel %vm707_vm4, %v706_v14, %v705_v18  ;;  %v1013_v15 = vsel %vm710_vm5, %v4825_v56, %v1012_v8 }
 0x2a7   :  { %v709_v20 = vrot.slane %v686_v17, 5 }
 0x2a9   :  { %v711_v23 = vsel %vm710_vm5, %v709_v20, %v708_v22 }
 0x2aa   :  { %v4891_v24 = vsel %vm232_vm2, %v711_v23, %v722_v30  ;;  %v741_v25 = vsel %vm232_vm2, %v711_v23, %v739_v21  ;;  %v1014_v21 = vsel %vm990_vm8, %v4832_v0, %v1013_v15 }
 0x2ab   :  { %3818 = vmatmul.mubr.msk.f32.vlgmr.msra.gmra.mrb[8].mxu0 %vm754_vm7, %v741_v25 }
 0x2ac   :  { %4069 = vmatpush3.bf16.msra.mxu0 %v4794_v45  ;;  %3841 = vmatprep.mubr.msk.f32.mxu0 %vm4495_vm6, %v4494_v1 }
 0x2ad   :  { %4070 = vmatprep.subr.bf16.mxu0 %v4493_v47 }
 0x2b0   :  { %4072 = vmatpush3.bf16.msra.mxu0 %v4820_v53 }
 0x2b1   :  { %3839 = vmatprep.subr.mxu0 %v4494_v1 }
 0x2b4   :  { %3840 = vmatpush3.msra.mxu0 %v4840_v5 }
 0x2b5   :  { %4079 = vmatprep.subr.bf16.mxu0 %v4493_v47 }
 0x37e   :  { %v824_v30 = vpop.f32.mrb[8].mxu0 }
 0x37f   :  { %v825_v31 = vadd.f32 %v4916_v29, %v824_v30  ;;  %v3819_v32 = vpop.f32.mrb[9].mxu0 }
 0x381   :  { %v828_v33 = vmax.f32 %v825_v31, 0.0 }
 0x383   :  { %3829 = vmatmul.mubr.msk.f32.vlgmr.msra.gmra.mrb[8].mxu1 %vm232_vm2, %v828_v33 }
 0x384   :  { %4075 = vmatpush3.bf16.msra.mxu1 %v4860_v19  ;;  %3852 = vmatprep.mubr.msk.f32.mxu1 %vm4495_vm6, %v4494_v1 }
 0x385   :  { %4076 = vmatprep.subr.bf16.mxu1 %v4493_v47 }
 0x388   :  { %4078 = vmatpush3.bf16.msra.mxu1 %v4909_v28 }
 0x389   :  { %4085 = vmatprep.subr.bf16.mxu1 %v4493_v47 }
 0x456   :  { %v909_v35 = vpop.f32.mrb[8].mxu1 }
 0x457   :  { %v4932_v36 = vadd.f32 %v4929_v34, %v909_v35  ;;  %v3830_v39 = vpop.f32.mrb[9].mxu1 }
 0x459   :  { %v913_v41 = vmul.f32 1.442695, %v4932_v36 }
 0x45b   :  { %4232 = vpow2.f32 %v913_v41 }
 0x465   :  { %v4233_v42 = vpop.eup %4232 }
 0x466   :  { %v915_v43 = vadd.f32 1e-08, %v4233_v42 }
 0x468   :  { %4234 = vrcp.f32 %v915_v43 }
 0x472   :  { %v4235_v44 = vpop.eup %4234 }
 0x473   :  { %918 = vrot.lane.b32.xlu1 %v4235_v44, %s4492_s4  ;;  %v942_v48 = vadd.f32 %v4235_v44, %v4772_v37  ;;  %v935_v51 = vrot.slane %v4235_v44, 1  ;;  %v934_v52 = vrot.slane %v4235_v44, 7  ;;  %v936_v54 = vrot.slane %v4235_v44, 2 }
 0x475   :  { %4236 = vrcp.f32 %v942_v48  ;;  %v943_v59 = vadd.f32 %v935_v51, %v4796_v46  ;;  %v941_v62 = vadd.f32 %v934_v52, %v4776_v38  ;;  %v944_v2 = vadd.f32 %v936_v54, %v4780_v40 }
 0x477   :  { %4238 = vrcp.f32 %v943_v59 }
 0x478   :  { %4240 = vrcp.f32 %v941_v62 }
 0x479   :  { %4242 = vrcp.f32 %v944_v2 }
 0x47f   :  { %v4237_v3 = vpop.eup %4236 }
 0x480   :  { %955 = vrot.lane.b32.xlu0 %v4237_v3, %s4492_s4  ;;  %v970_v9 = vadd.f32 1e-08, %v4237_v3 }
 0x481   :  { %v4239_v13 = vpop.eup %4238 }
 0x482   :  { %v4241_v14 = vpop.eup %4240  ;;  %957 = vrot.lane.b32.xlu1 %v4239_v13, %s4492_s4  ;;  %v971_v16 = vadd.f32 1e-08, %v4239_v13  ;;  %4244 = vlog2.f32 %v970_v9 }
 0x483   :  { %v4243_v17 = vpop.eup %4242  ;;  %v969_v18 = vadd.f32 1e-08, %v4241_v14 }
 0x484   :  { %953 = vrot.lane.b32.xlu0 %v4241_v14, %s4492_s4  ;;  %v972_v20 = vadd.f32 1e-08, %v4243_v17  ;;  %4246 = vlog2.f32 %v971_v16 }
 0x485   :  { %4248 = vlog2.f32 %v969_v18 }
 0x486   :  { %959 = vrot.lane.b32.xlu1 %v4243_v17, %s4492_s4  ;;  %4250 = vlog2.f32 %v972_v20 }
 0x488   :  { %1015 = vrot.lane.b32.xlu0 %v1014_v21, %s4496_s25 }
 0x48c   :  { %v4245_v22 = vpop.eup %4244 }
 0x48d   :  { %v976_v23 = vmul.f32 0.6931472, %v4245_v22 }
 0x48e   :  { %v4247_v25 = vpop.eup %4246 }
 0x48f   :  { %v4249_v26 = vpop.eup %4248  ;;  %v978_v27 = vmul.f32 0.6931472, %v4247_v25  ;;  %v997_v30 = vrot.slane %v976_v23, 7 }
 0x490   :  { %v4251_v31 = vpop.eup %4250  ;;  %v974_v32 = vmul.f32 0.6931472, %v4249_v26 }
 0x491   :  { %v980_v33 = vmul.f32 0.6931472, %v4251_v31  ;;  %v999_v35 = vrot.slane %v978_v27, 6 }
 0x492   :  { %v998_v39 = vsel %vm707_vm4, %v997_v30, %v974_v32 }
 0x493   :  { %v1000_v41 = vsel %vm710_vm5, %v999_v35, %v998_v39  ;;  %v1001_v42 = vrot.slane %v980_v33, 5 }
 0x495   :  { %v1002_v43 = vsel %vm990_vm8, %v1001_v42, %v1000_v41 }
 0x4e5   :  { %v919_v44 = vpop.permute.xlu1 %918 }
 0x4e6   :  { %v921_v48 = vmul.f32 %v919_v44, %v4932_v36 }
 0x4e8   :  { %v924_v51 = vrot.slane %v921_v48, 1  ;;  %v931_v52 = vadd.f32 %v921_v48, %v4873_v58  ;;  %v923_v54 = vrot.slane %v921_v48, 7  ;;  %v925_v3 = vrot.slane %v921_v48, 2 }
 0x4ea   :  { %v932_v2 = vadd.f32 %v924_v51, %v4876_v60  ;;  %v930_v13 = vadd.f32 %v923_v54, %v4879_v7  ;;  %v933_v17 = vadd.f32 %v925_v3, %v4883_v11 }
 0x4f2   :  { %v956_v59 = vpop.permute.xlu0 %955 }
 0x4f3   :  { %v966_v62 = vmul.f32 %v956_v59, %v931_v52 }
 0x4f4   :  { %v958_v8 = vpop.permute.xlu1 %957 }
 0x4f5   :  { %v967_v9 = vmul.f32 %v958_v8, %v932_v2  ;;  %v985_v15 = vrot.slane %v966_v62, 7 }
 0x4f6   :  { %v954_v14 = vpop.permute.xlu0 %953 }
 0x4f7   :  { %v965_v16 = vmul.f32 %v954_v14, %v930_v13  ;;  %v987_v18 = vrot.slane %v967_v9, 6 }
 0x4f8   :  { %v960_v20 = vpop.permute.xlu1 %959 }
 0x4f9   :  { %v986_v21 = vsel %vm707_vm4, %v985_v15, %v965_v16  ;;  %v968_v22 = vmul.f32 %v960_v20, %v933_v17  ;;  %v1266_v17 = vsel %vm710_vm5, %v4804_v49, %v4811_v50 }
 0x4fa   :  { %v1016_v25 = vpop.permute.xlu0 %1015  ;;  %v988_v26 = vsel %vm710_vm5, %v987_v18, %v986_v21 }
 0x4fb   :  { %v989_v23 = vrot.slane %v968_v22, 5 }
 0x4fd   :  { %v991_v27 = vsel %vm990_vm8, %v989_v23, %v988_v26  ;;  %v1267_v23 = vsel %vm990_vm8, %v4825_v56, %v1266_v17 }
 0x4fe   :  { %v1018_v30 = vsel %vm232_vm2, %v991_v27, %v1016_v25  ;;  %v4965_v31 = vsel %vm232_vm2, %v991_v27, %v1002_v43  ;;  %v1268_v26 = vsel %vm1244_vm9, %v4832_v0, %v1267_v23 }
 0x4ff   :  { %v1020_v32 = vrot.slane %v1018_v30, 1 }
 0x501   :  { %3842 = vmatmul.mubr.msk.f32.vlgmr.msra.gmra.mrb[10].mxu0 %vm754_vm7, %v1020_v32 }
 0x502   :  { %4081 = vmatpush3.bf16.msra.mxu0 %v4794_v45  ;;  %3865 = vmatprep.mubr.msk.f32.mxu0 %vm4495_vm6, %v4494_v1 }
 0x503   :  { %4082 = vmatprep.subr.bf16.mxu0 %v4493_v47 }
 0x506   :  { %4084 = vmatpush3.bf16.msra.mxu0 %v4820_v53 }
 0x507   :  { %3863 = vmatprep.subr.mxu0 %v4494_v1 }
 0x50a   :  { %3864 = vmatpush3.msra.mxu0 %v4840_v5 }
 0x50b   :  { %4097 = vmatprep.subr.bf16.mxu0 %v4493_v47 }
 0x5d4   :  { %v1089_v33 = vpop.f32.mrb[10].mxu0 }
 0x5d5   :  { %v1090_v35 = vadd.f32 %v4916_v29, %v1089_v33  ;;  %v3843_v39 = vpop.f32.mrb[11].mxu0 }
 0x5d7   :  { %v1093_v41 = vmax.f32 %v1090_v35, 0.0 }
 0x5d9   :  { %3853 = vmatmul.mubr.msk.f32.vlgmr.msra.gmra.mrb[10].mxu1 %vm232_vm2, %v1093_v41 }
 0x5da   :  { %4087 = vmatpush3.bf16.msra.mxu1 %v4860_v19  ;;  %3876 = vmatprep.mubr.msk.f32.mxu1 %vm4495_vm6, %v4494_v1 }
 0x5db   :  { %4088 = vmatprep.subr.bf16.mxu1 %v4493_v47 }
 0x5de   :  { %4090 = vmatpush3.bf16.msra.mxu1 %v4909_v28 }
 0x5df   :  { %4091 = vmatprep.subr.bf16.mxu1 %v4493_v47 }
 0x6ac   :  { %v1163_v42 = vpop.f32.mrb[10].mxu1 }
 0x6ad   :  { %v4985_v43 = vadd.f32 %v4929_v34, %v1163_v42  ;;  %v3854_v44 = vpop.f32.mrb[11].mxu1 }
 0x6af   :  { %v1167_v48 = vmul.f32 1.442695, %v4985_v43 }
 0x6b1   :  { %4252 = vpow2.f32 %v1167_v48 }
 0x6bb   :  { %v4253_v51 = vpop.eup %4252 }
 0x6bc   :  { %v1169_v52 = vadd.f32 1e-08, %v4253_v51 }
 0x6be   :  { %4254 = vrcp.f32 %v1169_v52 }
 0x6c8   :  { %v4255_v54 = vpop.eup %4254 }
 0x6c9   :  { %1172 = vrot.lane.b32.xlu1 %v4255_v54, %s4492_s4  ;;  %v1197_v59 = vadd.f32 %v4255_v54, %v4796_v46  ;;  %v1189_v62 = vrot.slane %v4255_v54, 7  ;;  %v1190_v2 = vrot.slane %v4255_v54, 1  ;;  %v1188_v3 = vrot.slane %v4255_v54, 6 }
 0x6cb   :  { %4256 = vrcp.f32 %v1197_v59  ;;  %v1196_v8 = vadd.f32 %v1189_v62, %v4772_v37  ;;  %v1198_v9 = vadd.f32 %v1190_v2, %v4780_v40  ;;  %v1195_v13 = vadd.f32 %v1188_v3, %v4776_v38 }
 0x6cd   :  { %4258 = vrcp.f32 %v1196_v8 }
 0x6ce   :  { %4260 = vrcp.f32 %v1198_v9 }
 0x6cf   :  { %4262 = vrcp.f32 %v1195_v13 }
 0x6d5   :  { %v4257_v14 = vpop.eup %4256 }
 0x6d6   :  { %1211 = vrot.lane.b32.xlu1 %v4257_v14, %s4492_s4  ;;  %v1225_v15 = vadd.f32 1e-08, %v4257_v14 }
 0x6d7   :  { %v4259_v16 = vpop.eup %4258 }
 0x6d8   :  { %v4261_v18 = vpop.eup %4260  ;;  %1209 = vrot.lane.b32.xlu0 %v4259_v16, %s4492_s4  ;;  %v1224_v20 = vadd.f32 1e-08, %v4259_v16  ;;  %4264 = vlog2.f32 %v1225_v15 }
 0x6d9   :  { %v4263_v21 = vpop.eup %4262  ;;  %v1226_v22 = vadd.f32 1e-08, %v4261_v18 }
 0x6da   :  { %1213 = vrot.lane.b32.xlu1 %v4261_v18, %s4492_s4  ;;  %v1223_v25 = vadd.f32 1e-08, %v4263_v21  ;;  %4266 = vlog2.f32 %v1224_v20 }
 0x6db   :  { %4268 = vlog2.f32 %v1226_v22 }
 0x6dc   :  { %1207 = vrot.lane.b32.xlu0 %v4263_v21, %s4492_s4  ;;  %4270 = vlog2.f32 %v1223_v25 }
 0x6e0   :  { %1269 = vrot.lane.b32.xlu0 %v1268_v26, %s4496_s25 }
 0x6e2   :  { %v4265_v27 = vpop.eup %4264 }
 0x6e3   :  { %v1232_v32 = vmul.f32 0.6931472, %v4265_v27 }
 0x6e4   :  { %v4267_v30 = vpop.eup %4266 }
 0x6e5   :  { %v4269_v33 = vpop.eup %4268  ;;  %v1230_v35 = vmul.f32 0.6931472, %v4267_v30  ;;  %v1253_v48 = vrot.slane %v1232_v32, 6 }
 0x6e6   :  { %v4271_v39 = vpop.eup %4270  ;;  %v1234_v41 = vmul.f32 0.6931472, %v4269_v33 }
 0x6e7   :  { %v1228_v42 = vmul.f32 0.6931472, %v4271_v39  ;;  %v1251_v44 = vrot.slane %v1230_v35, 7 }
 0x6e8   :  { %v1255_v52 = vrot.slane %v1234_v41, 5 }
 0x6e9   :  { %v1252_v51 = vsel %vm710_vm5, %v1251_v44, %v1228_v42 }
 0x6ea   :  { %v1254_v54 = vsel %vm990_vm8, %v1253_v48, %v1252_v51 }
 0x6eb   :  { %v1256_v59 = vsel %vm1244_vm9, %v1255_v52, %v1254_v54 }
 0x73b   :  { %v1173_v62 = vpop.permute.xlu1 %1172 }
 0x73c   :  { %v1175_v2 = vmul.f32 %v1173_v62, %v4985_v43 }
 0x73e   :  { %v1178_v3 = vrot.slane %v1175_v2, 7  ;;  %v1179_v8 = vrot.slane %v1175_v2, 1  ;;  %v1177_v14 = vrot.slane %v1175_v2, 6  ;;  %v1186_v15 = vadd.f32 %v1175_v2, %v4876_v60 }
 0x740   :  { %v1185_v13 = vadd.f32 %v1178_v3, %v4873_v58  ;;  %v1187_v18 = vadd.f32 %v1179_v8, %v4883_v11  ;;  %v1184_v23 = vadd.f32 %v1177_v14, %v4879_v7 }
 0x748   :  { %v1212_v9 = vpop.permute.xlu1 %1211 }
 0x749   :  { %v1221_v20 = vmul.f32 %v1212_v9, %v1186_v15 }
 0x74a   :  { %v1210_v16 = vpop.permute.xlu0 %1209 }
 0x74b   :  { %v1220_v17 = vmul.f32 %v1210_v16, %v1185_v13  ;;  %v1241_v30 = vrot.slane %v1221_v20, 6 }
 0x74c   :  { %v1214_v21 = vpop.permute.xlu1 %1213 }
 0x74d   :  { %v1222_v22 = vmul.f32 %v1214_v21, %v1187_v18  ;;  %v1239_v26 = vrot.slane %v1220_v17, 7 }
 0x74e   :  { %v1208_v25 = vpop.permute.xlu0 %1207 }
 0x74f   :  { %v1219_v27 = vmul.f32 %v1208_v25, %v1184_v23  ;;  %v1243_v32 = vrot.slane %v1222_v22, 5 }
 0x751   :  { %v1240_v33 = vsel %vm710_vm5, %v1239_v26, %v1219_v27  ;;  %vm3020_vm5 = vcmask 1040384  }
 0x752   :  { %v1242_v35 = vsel %vm990_vm8, %v1241_v30, %v1240_v33  ;;  %v1270_v39 = vpop.permute.xlu0 %1269  ;;  %v1520_v30 = vsel %vm990_vm8, %v4804_v49, %v4811_v50 }
 0x753   :  { %v1245_v41 = vsel %vm1244_vm9, %v1243_v32, %v1242_v35 }
 0x754   :  { %v1272_v42 = vsel %vm232_vm2, %v1245_v41, %v1270_v39  ;;  %v5018_v44 = vsel %vm232_vm2, %v1245_v41, %v1256_v59  ;;  %v1521_v41 = vsel %vm1244_vm9, %v4825_v56, %v1520_v30 }
 0x755   :  { %v1274_v48 = vrot.slane %v1272_v42, 2  ;;  %v1522_v42 = vsel %vm1498_vm10, %v4832_v0, %v1521_v41 }
 0x757   :  { %3866 = vmatmul.mubr.msk.f32.vlgmr.msra.gmra.mrb[12].mxu0 %vm754_vm7, %v1274_v48 }
 0x758   :  { %4099 = vmatpush3.bf16.msra.mxu0 %v4860_v19  ;;  %3900 = vmatprep.mubr.msk.f32.mxu0 %vm4495_vm6, %v4494_v1 }
 0x759   :  { %4100 = vmatprep.subr.bf16.mxu0 %v4493_v47 }
 0x75c   :  { %4102 = vmatpush3.bf16.msra.mxu0 %v4909_v28 }
 0x75d   :  { %4103 = vmatprep.subr.bf16.mxu0 %v4493_v47 }
 0x82a   :  { %v1343_v51 = vpop.f32.mrb[12].mxu0 }
 0x82b   :  { %v1344_v52 = vadd.f32 %v4916_v29, %v1343_v51  ;;  %v3867_v54 = vpop.f32.mrb[13].mxu0 }
 0x82d   :  { %v1347_v59 = vmax.f32 %v1344_v52, 0.0 }
 0x82f   :  { %3877 = vmatmul.mubr.msk.f32.vlgmr.msra.gmra.mrb[12].mxu1 %vm232_vm2, %v1347_v59 }
 0x830   :  { %4093 = vmatpush3.bf16.msra.mxu1 %v4794_v45  ;;  %3889 = vmatprep.mubr.msk.f32.mxu1 %vm4495_vm6, %v4494_v1 }
 0x831   :  { %4094 = vmatprep.subr.bf16.mxu1 %v4493_v47 }
 0x834   :  { %4096 = vmatpush3.bf16.msra.mxu1 %v4820_v53 }
 0x835   :  { %3887 = vmatprep.subr.mxu1 %v4494_v1 }
 0x838   :  { %3888 = vmatpush3.msra.mxu1 %v4840_v5 }
 0x839   :  { %4109 = vmatprep.subr.bf16.mxu1 %v4493_v47 }
 0x902   :  { %v1417_v62 = vpop.f32.mrb[12].mxu1 }
 0x903   :  { %v5038_v2 = vadd.f32 %v4929_v34, %v1417_v62  ;;  %v3878_v3 = vpop.f32.mrb[13].mxu1 }
 0x905   :  { %v1421_v8 = vmul.f32 1.442695, %v5038_v2 }
 0x907   :  { %4272 = vpow2.f32 %v1421_v8 }
 0x911   :  { %v4273_v9 = vpop.eup %4272 }
 0x912   :  { %v1423_v13 = vadd.f32 1e-08, %v4273_v9 }
 0x914   :  { %4274 = vrcp.f32 %v1423_v13 }
 0x91e   :  { %v4275_v14 = vpop.eup %4274 }
 0x91f   :  { %1426 = vrot.lane.b32.xlu1 %v4275_v14, %s4492_s4  ;;  %v1444_v15 = vrot.slane %v4275_v14, 7  ;;  %v1443_v16 = vrot.slane %v4275_v14, 6  ;;  %v1452_v17 = vadd.f32 %v4275_v14, %v4780_v40  ;;  %v1442_v18 = vrot.slane %v4275_v14, 5 }
 0x921   :  { %v1451_v20 = vadd.f32 %v1444_v15, %v4796_v46  ;;  %v1450_v21 = vadd.f32 %v1443_v16, %v4772_v37  ;;  %4276 = vrcp.f32 %v1452_v17  ;;  %v1449_v22 = vadd.f32 %v1442_v18, %v4776_v38 }
 0x923   :  { %4278 = vrcp.f32 %v1451_v20 }
 0x924   :  { %4280 = vrcp.f32 %v1450_v21 }
 0x925   :  { %4282 = vrcp.f32 %v1449_v22 }
 0x92b   :  { %v4277_v23 = vpop.eup %4276 }
 0x92c   :  { %v1480_v25 = vadd.f32 1e-08, %v4277_v23 }
 0x92d   :  { %v4279_v26 = vpop.eup %4278 }
 0x92e   :  { %v4281_v27 = vpop.eup %4280  ;;  %1465 = vrot.lane.b32.xlu1 %v4279_v26, %s4492_s4  ;;  %v1479_v32 = vadd.f32 1e-08, %v4279_v26  ;;  %4284 = vlog2.f32 %v1480_v25 }
 0x92f   :  { %v4283_v33 = vpop.eup %4282  ;;  %1463 = vrot.lane.b32.xlu0 %v4281_v27, %s4492_s4  ;;  %v1478_v35 = vadd.f32 1e-08, %v4281_v27 }
 0x930   :  { %v1477_v39 = vadd.f32 1e-08, %v4283_v33  ;;  %4286 = vlog2.f32 %v1479_v32 }
 0x931   :  { %4288 = vlog2.f32 %v1478_v35 }
 0x932   :  { %1467 = vrot.lane.b32.xlu1 %v4277_v23, %s4492_s4  ;;  %4290 = vlog2.f32 %v1477_v39 }
 0x933   :  { %1461 = vrot.lane.b32.xlu0 %v4283_v33, %s4492_s4 }
 0x937   :  { %1523 = vrot.lane.b32.xlu0 %v1522_v42, %s4496_s25 }
 0x938   :  { %v4285_v48 = vpop.eup %4284 }
 0x939   :  { %v1488_v3 = vmul.f32 0.6931472, %v4285_v48 }
 0x93a   :  { %v4287_v51 = vpop.eup %4286 }
 0x93b   :  { %v4289_v52 = vpop.eup %4288  ;;  %v1486_v54 = vmul.f32 0.6931472, %v4287_v51  ;;  %v1509_v15 = vrot.slane %v1488_v3, 5 }
 0x93c   :  { %v4291_v59 = vpop.eup %4290  ;;  %v1484_v62 = vmul.f32 0.6931472, %v4289_v52 }
 0x93d   :  { %v1507_v8 = vrot.slane %v1486_v54, 6  ;;  %v1482_v9 = vmul.f32 0.6931472, %v4291_v59 }
 0x93e   :  { %v1505_v13 = vrot.slane %v1484_v62, 7 }
 0x940   :  { %v1506_v14 = vsel %vm990_vm8, %v1505_v13, %v1482_v9 }
 0x941   :  { %v1508_v16 = vsel %vm1244_vm9, %v1507_v8, %v1506_v14 }
 0x942   :  { %v1510_v17 = vsel %vm1498_vm10, %v1509_v15, %v1508_v16 }
 0x991   :  { %v1427_v18 = vpop.permute.xlu1 %1426 }
 0x992   :  { %v1429_v20 = vmul.f32 %v1427_v18, %v5038_v2 }
 0x994   :  { %v1432_v21 = vrot.slane %v1429_v20, 6  ;;  %v1433_v22 = vrot.slane %v1429_v20, 7  ;;  %v1431_v26 = vrot.slane %v1429_v20, 5  ;;  %v1441_v35 = vadd.f32 %v1429_v20, %v4883_v11 }
 0x996   :  { %v1439_v25 = vadd.f32 %v1432_v21, %v4873_v58  ;;  %v1440_v27 = vadd.f32 %v1433_v22, %v4876_v60  ;;  %v1438_v41 = vadd.f32 %v1431_v26, %v4879_v7 }
 0x9a0   :  { %v1466_v23 = vpop.permute.xlu1 %1465 }
 0x9a1   :  { %v1464_v30 = vpop.permute.xlu0 %1463  ;;  %v1475_v33 = vmul.f32 %v1466_v23, %v1440_v27 }
 0x9a2   :  { %v1474_v32 = vmul.f32 %v1464_v30, %v1439_v25 }
 0x9a3   :  { %v1495_v54 = vrot.slane %v1475_v33, 6 }
 0x9a4   :  { %v1468_v39 = vpop.permute.xlu1 %1467  ;;  %v1493_v51 = vrot.slane %v1474_v32, 7 }
 0x9a5   :  { %v1476_v42 = vmul.f32 %v1468_v39, %v1441_v35  ;;  %v1462_v48 = vpop.permute.xlu0 %1461 }
 0x9a6   :  { %v1473_v52 = vmul.f32 %v1462_v48, %v1438_v41 }
 0x9a7   :  { %v1497_v59 = vrot.slane %v1476_v42, 5 }
 0x9a8   :  { %v1494_v62 = vsel %vm990_vm8, %v1493_v51, %v1473_v52  ;;  %vm3043_vm8 = vcmask 1045504  }
 0x9a9   :  { %v1496_v3 = vsel %vm1244_vm9, %v1495_v54, %v1494_v62  ;;  %v1524_v8 = vpop.permute.xlu0 %1523 }
 0x9aa   :  { %v1499_v9 = vsel %vm1498_vm10, %v1497_v59, %v1496_v3  ;;  %v1776_v59 = vsel %vm1244_vm9, %v4804_v49, %v4811_v50 }
 0x9ab   :  { %v1526_v13 = vsel %vm232_vm2, %v1499_v9, %v1524_v8  ;;  %v5071_v14 = vsel %vm232_vm2, %v1499_v9, %v1510_v17 }
 0x9ac   :  { %v1528_v15 = vrot.slane %v1526_v13, 3 }
 0x9ae   :  { %3890 = vmatmul.mubr.msk.f32.vlgmr.msra.gmra.mrb[14].mxu1 %vm754_vm7, %v1528_v15  ;;  %v1777_v15 = vsel %vm1498_vm10, %v4825_v56, %v1776_v59 }
 0x9af   :  { %4111 = vmatpush3.bf16.msra.mxu1 %v4860_v19  ;;  %3924 = vmatprep.mubr.msk.f32.mxu1 %vm4495_vm6, %v4494_v1  ;;  %v1778_v50 = vsel %vm1754_vm11, %v4832_v0, %v1777_v15 }
 0x9b0   :  { %4112 = vmatprep.subr.bf16.mxu1 %v4493_v47 }
 0x9b3   :  { %4114 = vmatpush3.bf16.msra.mxu1 %v4909_v28 }
 0x9b4   :  { %4115 = vmatprep.subr.bf16.mxu1 %v4493_v47 }
 0xa81   :  { %v1597_v16 = vpop.f32.mrb[14].mxu1 }
 0xa82   :  { %v1598_v18 = vadd.f32 %v4916_v29, %v1597_v16  ;;  %v3891_v20 = vpop.f32.mrb[15].mxu1 }
 0xa84   :  { %v1601_v17 = vmax.f32 %v1598_v18, 0.0 }
 0xa86   :  { %3901 = vmatmul.mubr.msk.f32.vlgmr.msra.gmra.mrb[14].mxu0 %vm232_vm2, %v1601_v17 }
 0xa87   :  { %4105 = vmatpush3.bf16.msra.mxu0 %v4794_v45  ;;  %3913 = vmatprep.mubr.msk.f32.mxu0 %vm4495_vm6, %v4494_v1 }
 0xa88   :  { %4106 = vmatprep.subr.bf16.mxu0 %v4493_v47 }
 0xa8b   :  { %4108 = vmatpush3.bf16.msra.mxu0 %v4820_v53 }
 0xa8c   :  { %3911 = vmatprep.subr.mxu0 %v4494_v1 }
 0xa8f   :  { %3912 = vmatpush3.msra.mxu0 %v4840_v5 }
 0xa90   :  { %4121 = vmatprep.subr.bf16.mxu0 %v4493_v47 }
 0xb59   :  { %v1671_v21 = vpop.f32.mrb[14].mxu0 }
 0xb5a   :  { %v5091_v22 = vadd.f32 %v4929_v34, %v1671_v21  ;;  %v3902_v23 = vpop.f32.mrb[15].mxu0 }
 0xb5c   :  { %v1675_v25 = vmul.f32 1.442695, %v5091_v22 }
 0xb5e   :  { %4292 = vpow2.f32 %v1675_v25 }
 0xb68   :  { %v4293_v26 = vpop.eup %4292 }
 0xb69   :  { %v1677_v27 = vadd.f32 1e-08, %v4293_v26 }
 0xb6b   :  { %4294 = vrcp.f32 %v1677_v27 }
 0xb75   :  { %v4295_v30 = vpop.eup %4294 }
 0xb76   :  { %1680 = vrot.lane.b32.xlu1 %v4295_v30, %s4492_s4  ;;  %v1699_v32 = vrot.slane %v4295_v30, 6  ;;  %v1698_v33 = vrot.slane %v4295_v30, 5  ;;  %v1700_v35 = vrot.slane %v4295_v30, 7  ;;  %v1697_v39 = vrot.slane %v4295_v30, 4 }
 0xb78   :  { %v1707_v41 = vadd.f32 %v1699_v32, %v4796_v46  ;;  %v1706_v42 = vadd.f32 %v1698_v33, %v4772_v37  ;;  %v1708_v48 = vadd.f32 %v1700_v35, %v4780_v40  ;;  %v1705_v51 = vadd.f32 %v1697_v39, %v4776_v38 }
 0xb7a   :  { %4296 = vrcp.f32 %v1707_v41 }
 0xb7b   :  { %4298 = vrcp.f32 %v1706_v42 }
 0xb7c   :  { %4300 = vrcp.f32 %v1708_v48 }
 0xb7d   :  { %4302 = vrcp.f32 %v1705_v51 }
 0xb84   :  { %v4297_v52 = vpop.eup %4296 }
 0xb85   :  { %v4299_v54 = vpop.eup %4298  ;;  %1721 = vrot.lane.b32.xlu1 %v4297_v52, %s4492_s4  ;;  %v1735_v62 = vadd.f32 1e-08, %v4297_v52 }
 0xb86   :  { %v4301_v3 = vpop.eup %4300  ;;  %1719 = vrot.lane.b32.xlu0 %v4299_v54, %s4492_s4  ;;  %v1734_v8 = vadd.f32 1e-08, %v4299_v54 }
 0xb87   :  { %v4303_v9 = vpop.eup %4302  ;;  %v1736_v13 = vadd.f32 1e-08, %v4301_v3  ;;  %4304 = vlog2.f32 %v1735_v62 }
 0xb88   :  { %v1733_v16 = vadd.f32 1e-08, %v4303_v9  ;;  %4306 = vlog2.f32 %v1734_v8 }
 0xb89   :  { %1723 = vrot.lane.b32.xlu1 %v4301_v3, %s4492_s4  ;;  %4308 = vlog2.f32 %v1736_v13 }
 0xb8a   :  { %1717 = vrot.lane.b32.xlu0 %v4303_v9, %s4492_s4  ;;  %4310 = vlog2.f32 %v1733_v16 }
 0xb8e   :  { %1779 = vrot.lane.b32.xlu0 %v1778_v50, %s4496_s25 }
 0xb91   :  { %v4305_v18 = vpop.eup %4304 }
 0xb92   :  { %v4307_v20 = vpop.eup %4306  ;;  %v1742_v17 = vmul.f32 0.6931472, %v4305_v18 }
 0xb93   :  { %v4309_v21 = vpop.eup %4308  ;;  %v1740_v23 = vmul.f32 0.6931472, %v4307_v20 }
 0xb94   :  { %v4311_v25 = vpop.eup %4310  ;;  %v1744_v26 = vmul.f32 0.6931472, %v4309_v21  ;;  %v1763_v27 = vrot.slane %v1742_v17, 6 }
 0xb95   :  { %v1738_v30 = vmul.f32 0.6931472, %v4311_v25  ;;  %v1761_v32 = vrot.slane %v1740_v23, 7 }
 0xb96   :  { %v1765_v35 = vrot.slane %v1744_v26, 5 }
 0xb97   :  { %v1762_v33 = vsel %vm1244_vm9, %v1761_v32, %v1738_v30 }
 0xb98   :  { %v1764_v39 = vsel %vm1498_vm10, %v1763_v27, %v1762_v33 }
 0xb99   :  { %v1766_v41 = vsel %vm1754_vm11, %v1765_v35, %v1764_v39 }
 0xbe8   :  { %v1681_v42 = vpop.permute.xlu1 %1680 }
 0xbe9   :  { %v1683_v48 = vmul.f32 %v1681_v42, %v5091_v22 }
 0xbeb   :  { %v1686_v51 = vrot.slane %v1683_v48, 5  ;;  %v1687_v52 = vrot.slane %v1683_v48, 6  ;;  %v1688_v54 = vrot.slane %v1683_v48, 7  ;;  %v1685_v3 = vrot.slane %v1683_v48, 4 }
 0xbed   :  { %v1694_v62 = vadd.f32 %v1686_v51, %v4873_v58  ;;  %v1695_v8 = vadd.f32 %v1687_v52, %v4876_v60  ;;  %v1696_v16 = vadd.f32 %v1688_v54, %v4883_v11  ;;  %v1693_v18 = vadd.f32 %v1685_v3, %v4879_v7 }
 0xbf7   :  { %v1722_v59 = vpop.permute.xlu1 %1721 }
 0xbf8   :  { %v1720_v9 = vpop.permute.xlu0 %1719  ;;  %v1731_v15 = vmul.f32 %v1722_v59, %v1695_v8 }
 0xbf9   :  { %v1730_v13 = vmul.f32 %v1720_v9, %v1694_v62 }
 0xbfa   :  { %v1751_v25 = vrot.slane %v1731_v15, 6 }
 0xbfb   :  { %v1724_v50 = vpop.permute.xlu1 %1723  ;;  %v1749_v21 = vrot.slane %v1730_v13, 7 }
 0xbfc   :  { %v1732_v20 = vmul.f32 %v1724_v50, %v1696_v16  ;;  %v1718_v17 = vpop.permute.xlu0 %1717 }
 0xbfd   :  { %v1729_v23 = vmul.f32 %v1718_v17, %v1693_v18 }
 0xbfe   :  { %v1753_v26 = vrot.slane %v1732_v20, 5 }
 0xbff   :  { %v1750_v27 = vsel %vm1244_vm9, %v1749_v21, %v1729_v23 }
 0xc00   :  { %v1752_v30 = vsel %vm1498_vm10, %v1751_v25, %v1750_v27  ;;  %v1780_v32 = vpop.permute.xlu0 %1779 }
 0xc01   :  { %v1755_v33 = vsel %vm1754_vm11, %v1753_v26, %v1752_v30  ;;  %v5157_v30 = vld [vmem:[%s5667_s8] sm:$0xff] }
 0xc02   :  { %v1782_v35 = vsel %vm232_vm2, %v1755_v33, %v1780_v32  ;;  %v5124_v39 = vsel %vm232_vm2, %v1755_v33, %v1766_v41  ;;  %v2034_v32 = vsel %vm1498_vm10, %v4804_v49, %v5157_v30 }
 0xc03   :  { %v1784_v42 = vrot.slane %v1782_v35, 4  ;;  %v2035_v35 = vsel %vm1754_vm11, %v4825_v56, %v2034_v32 }
 0xc05   :  { %3914 = vmatmul.mubr.msk.f32.vlgmr.msra.gmra.mrb[16].mxu0 %vm754_vm7, %v1784_v42 }
 0xc06   :  { %4123 = vmatpush3.bf16.msra.mxu0 %v4860_v19  ;;  %3948 = vmatprep.mubr.msk.f32.mxu0 %vm4495_vm6, %v4494_v1 }
 0xc07   :  { %4124 = vmatprep.subr.bf16.mxu0 %v4493_v47 }
 0xc0a   :  { %4126 = vmatpush3.bf16.msra.mxu0 %v4909_v28 }
 0xc0b   :  { %4127 = vmatprep.subr.bf16.mxu0 %v4493_v47 }
 0xcd8   :  { %v1853_v48 = vpop.f32.mrb[16].mxu0 }
 0xcd9   :  { %v1854_v51 = vadd.f32 %v4916_v29, %v1853_v48  ;;  %v3915_v52 = vpop.f32.mrb[17].mxu0 }
 0xcdb   :  { %v1857_v41 = vmax.f32 %v1854_v51, 0.0 }
 0xcdd   :  { %3925 = vmatmul.mubr.msk.f32.vlgmr.msra.gmra.mrb[16].mxu1 %vm232_vm2, %v1857_v41 }
 0xcde   :  { %4117 = vmatpush3.bf16.msra.mxu1 %v4794_v45  ;;  %3937 = vmatprep.mubr.msk.f32.mxu1 %vm4495_vm6, %v4494_v1 }
 0xcdf   :  { %4118 = vmatprep.subr.bf16.mxu1 %v4493_v47 }
 0xce2   :  { %4120 = vmatpush3.bf16.msra.mxu1 %v4820_v53 }
 0xce3   :  { %3935 = vmatprep.subr.mxu1 %v4494_v1 }
 0xce6   :  { %3936 = vmatpush3.msra.mxu1 %v4840_v5 }
 0xce7   :  { %4133 = vmatprep.subr.bf16.mxu1 %v4493_v47 }
 0xdb0   :  { %v1927_v29 = vpop.f32.mrb[16].mxu1 }
 0xdb1   :  { %v5144_v54 = vadd.f32 %v4929_v34, %v1927_v29  ;;  %v3926_v59 = vpop.f32.mrb[17].mxu1 }
 0xdb3   :  { %v1931_v62 = vmul.f32 1.442695, %v5144_v54 }
 0xdb5   :  { %4312 = vpow2.f32 %v1931_v62 }
 0xdbf   :  { %v4313_v3 = vpop.eup %4312 }
 0xdc0   :  { %v1933_v8 = vadd.f32 1e-08, %v4313_v3 }
 0xdc2   :  { %4314 = vrcp.f32 %v1933_v8 }
 0xdcc   :  { %v4315_v9 = vpop.eup %4314 }
 0xdcd   :  { %1936 = vrot.lane.b32.xlu1 %v4315_v9, %s4492_s4  ;;  %v1955_v13 = vrot.slane %v4315_v9, 5  ;;  %v1954_v15 = vrot.slane %v4315_v9, 4  ;;  %v1956_v16 = vrot.slane %v4315_v9, 6  ;;  %v1953_v5 = vrot.slane %v4315_v9, 3 }
 0xdcf   :  { %v1963_v50 = vadd.f32 %v1955_v13, %v4796_v46  ;;  %v1962_v18 = vadd.f32 %v1954_v15, %v4772_v37  ;;  %v1961_v34 = vadd.f32 %v1953_v5, %v4776_v38  ;;  %v1964_v20 = vadd.f32 %v1956_v16, %v4780_v40 }
 0xdd1   :  { %4316 = vrcp.f32 %v1963_v50 }
 0xdd2   :  { %4318 = vrcp.f32 %v1962_v18 }
 0xdd3   :  { %4320 = vrcp.f32 %v1961_v34 }
 0xdd4   :  { %4322 = vrcp.f32 %v1964_v20 }
 0xddb   :  { %v4317_v17 = vpop.eup %4316 }
 0xddc   :  { %v4319_v21 = vpop.eup %4318  ;;  %1977 = vrot.lane.b32.xlu1 %v4317_v17, %s4492_s4  ;;  %v1991_v23 = vadd.f32 1e-08, %v4317_v17 }
 0xddd   :  { %1975 = vrot.lane.b32.xlu0 %v4319_v21, %s4492_s4  ;;  %v1990_v25 = vadd.f32 1e-08, %v4319_v21  ;;  %v4321_v26 = vpop.eup %4320 }
 0xdde   :  { %4324 = vlog2.f32 %v1991_v23  ;;  %v4323_v27 = vpop.eup %4322  ;;  %v1989_v33 = vadd.f32 1e-08, %v4321_v26 }
 0xddf   :  { %4326 = vlog2.f32 %v1990_v25  ;;  %v1992_v9 = vadd.f32 1e-08, %v4323_v27 }
 0xde0   :  { %1979 = vrot.lane.b32.xlu1 %v4323_v27, %s4492_s4  ;;  %4328 = vlog2.f32 %v1989_v33 }
 0xde1   :  { %1973 = vrot.lane.b32.xlu0 %v4321_v26, %s4492_s4  ;;  %4330 = vlog2.f32 %v1992_v9 }
 0xde4   :  { %2038 = vrot.lane.b32.xlu1 %v4832_v0, %s4496_s25 }
 0xde5   :  { %2036 = vrot.lane.b32.xlu0 %v2035_v35, %s4496_s25 }
 0xde8   :  { %v4325_v42 = vpop.eup %4324 }
 0xde9   :  { %v4327_v48 = vpop.eup %4326  ;;  %v1998_v51 = vmul.f32 0.6931472, %v4325_v42 }
 0xdea   :  { %v1996_v52 = vmul.f32 0.6931472, %v4327_v48  ;;  %v4329_v41 = vpop.eup %4328 }
 0xdeb   :  { %v2018_v29 = vrot.slane %v1998_v51, 6  ;;  %v1994_v62 = vmul.f32 0.6931472, %v4329_v41  ;;  %v4331_v18 = vpop.eup %4330 }
 0xdec   :  { %v2016_v59 = vrot.slane %v1996_v52, 7  ;;  %v2000_v27 = vmul.f32 0.6931472, %v4331_v18 }
 0xdee   :  { %v2017_v3 = vsel %vm1498_vm10, %v2016_v59, %v1994_v62 }
 0xdef   :  { %v2019_v8 = vsel %vm1754_vm11, %v2018_v29, %v2017_v3  ;;  %v2020_v29 = vrot.slane %v2000_v27, 5 }
 0xe3f   :  { %v1937_v13 = vpop.permute.xlu1 %1936 }
 0xe40   :  { %v1939_v15 = vmul.f32 %v1937_v13, %v5144_v54 }
 0xe42   :  { %v1942_v16 = vrot.slane %v1939_v15, 4  ;;  %v1943_v5 = vrot.slane %v1939_v15, 5  ;;  %v1944_v50 = vrot.slane %v1939_v15, 6  ;;  %v1941_v17 = vrot.slane %v1939_v15, 3 }
 0xe44   :  { %v1950_v20 = vadd.f32 %v1942_v16, %v4873_v58  ;;  %v1951_v21 = vadd.f32 %v1943_v5, %v4876_v60  ;;  %v1952_v32 = vadd.f32 %v1944_v50, %v4883_v11  ;;  %v1949_v35 = vadd.f32 %v1941_v17, %v4879_v7 }
 0xe4e   :  { %v1978_v34 = vpop.permute.xlu1 %1977 }
 0xe4f   :  { %v1976_v23 = vpop.permute.xlu0 %1975  ;;  %v1987_v26 = vmul.f32 %v1978_v34, %v1951_v21 }
 0xe50   :  { %v1986_v25 = vmul.f32 %v1976_v23, %v1950_v20 }
 0xe51   :  { %v2007_v41 = vrot.slane %v1987_v26, 6  ;;  %v5212_v26 = vld [vmem:[%s5629_s22] ss:$0 sm:$0xff] }
 0xe52   :  { %v1980_v33 = vpop.permute.xlu1 %1979  ;;  %v2005_v51 = vrot.slane %v1986_v25, 7 }
 0xe53   :  { %v1988_v42 = vmul.f32 %v1980_v33, %v1952_v32  ;;  %v1974_v48 = vpop.permute.xlu0 %1973 }
 0xe54   :  { %v1985_v52 = vmul.f32 %v1974_v48, %v1949_v35 }
 0xe55   :  { %v2009_v59 = vrot.slane %v1988_v42, 5 }
 0xe56   :  { %v2006_v62 = vsel %vm1498_vm10, %v2005_v51, %v1985_v52  ;;  %v2039_v3 = vpop.permute.xlu1 %2038 }
 0xe57   :  { %v5178_v9 = vsel %vm232_vm2, %v2009_v59, %v2020_v29  ;;  %v2043_v13 = vsel %vm232_vm2, %v2009_v59, %v2039_v3  ;;  %v2008_v15 = vsel %vm1754_vm11, %v2007_v41, %v2006_v62  ;;  %v2037_v16 = vpop.permute.xlu0 %2036 }
 0xe58   :  { %v2048_v5 = vrot.slane %v2043_v13, 5  ;;  %v5183_v50 = vsel %vm232_vm2, %v2008_v15, %v2019_v8  ;;  %v2042_v18 = vsel %vm232_vm2, %v2008_v15, %v2037_v16  ;;  %v5196_v8 = vld [vmem:[%s5627_s20] ss:$0 sm:$0xff] }
 0xe59   :  { %v2047_v34 = vrot.slane %v2042_v18, 5 }
 0xe5b   :  { %v2049_v20 = vsel %vm2046_vm12, %v2047_v34, %v2048_v5  ;;  %v2300_v34 = vsel %vm704_vm3, %v4832_v0, %v4825_v56 }
 0xe5c   :  { %3938 = vmatmul.mubr.msk.f32.vlgmr.msra.gmra.mrb[18].mxu1 %vm754_vm7, %v2049_v20  ;;  %v2299_v20 = vsel %vm1754_vm11, %v4804_v49, %v5157_v30 }
 0xe5d   :  { %4135 = vmatpush3.bf16.msra.mxu1 %v4860_v19  ;;  %3972 = vmatprep.mubr.msk.f32.mxu1 %vm4495_vm6, %v4494_v1  ;;  %v4390_v19 = vld [vmem:[%s5626_s19 + $0x20] sm:$0xff]  ;;  %s4497_s19 = smov 64  }
 0xe5e   :  { %4136 = vmatprep.subr.bf16.mxu1 %v4493_v47 }
 0xe61   :  { %4138 = vmatpush3.bf16.msra.mxu1 %v4909_v28 }
 0xf2f   :  { %v2118_v17 = vpop.f32.mrb[18].mxu1 }
 0xf30   :  { %v2119_v21 = vadd.f32 %v5196_v8, %v2118_v17  ;;  %v3939_v23 = vpop.f32.mrb[19].mxu1  ;;  %v1259_v17 = vrot.slane %v4985_v43, 6 }
 0xf32   :  { %v2122_v25 = vmax.f32 %v2119_v21, 0.0  ;;  %v1005_v21 = vrot.slane %v4932_v36, 7 }
 0xf34   :  { %3949 = vmatmul.mubr.msk.f32.vlgmr.msra.gmra.mrb[18].mxu0 %vm232_vm2, %v2122_v25 }
 0xf35   :  { %4129 = vmatpush3.bf16.msra.mxu0 %v4794_v45  ;;  %3961 = vmatprep.mubr.msk.f32.mxu0 %vm4495_vm6, %v4494_v1  ;;  %vm3033_vm6 = vcmask 1043456  }
 0xf36   :  { %4130 = vmatprep.subr.bf16.mxu0 %v4493_v47 }
 0xf39   :  { %4132 = vmatpush3.bf16.msra.mxu0 %v4820_v53 }
 0xf3a   :  { %3959 = vmatprep.subr.mxu0 %v4494_v1 }
 0xf3d   :  { %3960 = vmatpush3.msra.mxu0 %v4390_v19  ;;  %v1769_v19 = vrot.slane %v5091_v22, 4 }
0x1007   :  { %v2192_v28 = vpop.f32.mrb[18].mxu0 }
0x1008   :  { %v5215_v45 = vadd.f32 %v5212_v26, %v2192_v28  ;;  %v3950_v32 = vpop.f32.mrb[19].mxu0  ;;  %v1513_v28 = vrot.slane %v5038_v2, 5 }
0x100a   :  { %v2196_v47 = vmul.f32 1.442695, %v5215_v45 }
0x100c   :  { %4332 = vpow2.f32 %v2196_v47 }
0x1016   :  { %v4333_v53 = vpop.eup %4332 }
0x1017   :  { %v2198_v1 = vadd.f32 1e-08, %v4333_v53 }
0x1019   :  { %4334 = vrcp.f32 %v2198_v1  ;;  %v2289_v1 = vrot.slane %v5215_v45, 2 }
0x1023   :  { %v4335_v27 = vpop.eup %4334 }
0x1024   :  { %2201 = vrot.lane.b32.xlu0 %v4335_v27, %s4492_s4  ;;  %v2220_v33 = vrot.slane %v4335_v27, 4  ;;  %v2219_v35 = vrot.slane %v4335_v27, 3  ;;  %v2221_v42 = vrot.slane %v4335_v27, 5  ;;  %v2218_v48 = vrot.slane %v4335_v27, 2 }
0x1026   :  { %v2228_v51 = vadd.f32 %v2220_v33, %v4796_v46  ;;  %v2227_v52 = vadd.f32 %v2219_v35, %v4772_v37  ;;  %v2229_v41 = vadd.f32 %v2221_v42, %v4780_v40  ;;  %v2226_v29 = vadd.f32 %v2218_v48, %v4776_v38 }
0x1027   :  { %v4498_v35 = vmov 1966171168   ;;  %v2568_v42 = vlaneseq }
0x1028   :  { %4336 = vrcp.f32 %v2228_v51  ;;  %v2566_v2 = vunpack.c.l.s4 %v4498_v35 }
0x1029   :  { %4338 = vrcp.f32 %v2227_v52  ;;  %v2569_v52 = vshrl.u32 %v2568_v42, 7 }
0x102a   :  { %4340 = vrcp.f32 %v2229_v41  ;;  %v2567_v51 = vunpack.c.0.s8 %v2566_v2  ;;  %v725_v41 = vsel %vm650_vm13, %v4891_v24, 0.0 }
0x102b   :  { %4342 = vrcp.f32 %v2226_v29 }
0x1032   :  { %v4337_v59 = vpop.eup %4336 }
0x1033   :  { %v4339_v62 = vpop.eup %4338  ;;  %2242 = vrot.lane.b32.xlu0 %v4337_v59, %s4492_s4  ;;  %v2256_v3 = vadd.f32 1e-08, %v4337_v59  ;;  %v5250_v59 = vsub.s32 %v2567_v51, %v2569_v52 }
0x1034   :  { %v4341_v13 = vpop.eup %4340  ;;  %2240 = vrot.lane.b32.xlu1 %v4339_v62, %s4492_s4  ;;  %v2255_v15 = vadd.f32 1e-08, %v4339_v62 }
0x1035   :  { %v4343_v16 = vpop.eup %4342  ;;  %v2257_v5 = vadd.f32 1e-08, %v4341_v13  ;;  %4344 = vlog2.f32 %v2256_v3  ;;  %v727_v3 = vsel %vm726_vm14, %v725_v41, 0.0 }
0x1036   :  { %v2254_v18 = vadd.f32 1e-08, %v4343_v16  ;;  %4346 = vlog2.f32 %v2255_v15 }
0x1037   :  { %2238 = vrot.lane.b32.xlu0 %v4343_v16, %s4492_s4  ;;  %4348 = vlog2.f32 %v2257_v5 }
0x1038   :  { %2244 = vrot.lane.b32.xlu1 %v4341_v13, %s4492_s4  ;;  %4350 = vlog2.f32 %v2254_v18 }
0x103b   :  { %2303 = vrot.lane.b32.xlu0 %v2300_v34, %s4496_s25 }
0x103c   :  { %2301 = vrot.lane.b32.xlu1 %v2299_v20, %s4496_s25 }
0x103f   :  { %v4345_v23 = vpop.eup %4344  ;;  %1260 = vrot.lane.b32.xlu0 %v1259_v17, %s4497_s19 }
0x1040   :  { %v4347_v25 = vpop.eup %4346  ;;  %1006 = vrot.lane.b32.xlu1 %v1005_v21, %s4497_s19  ;;  %v2263_v56 = vmul.f32 0.6931472, %v4345_v23 }
0x1041   :  { %v4349_v0 = vpop.eup %4348  ;;  %v2261_v49 = vmul.f32 0.6931472, %v4347_v25 }
0x1042   :  { %v4351_v30 = vpop.eup %4350  ;;  %v2265_v32 = vmul.f32 0.6931472, %v4349_v0  ;;  %v2283_v47 = vrot.slane %v2263_v56, 6 }
0x1043   :  { %1770 = vrot.lane.b32.xlu0 %v1769_v19, %s4497_s19  ;;  %v2259_v36 = vmul.f32 0.6931472, %v4351_v30  ;;  %v2281_v43 = vrot.slane %v2261_v49, 7 }
0x1044   :  { %1514 = vrot.lane.b32.xlu1 %v1513_v28, %s4497_s19  ;;  %v2284_v53 = vrot.slane %v2265_v32, 5 }
0x1045   :  { %v2282_v27 = vsel %vm1754_vm11, %v2281_v43, %v2259_v36 }
0x1046   :  { %v2285_v33 = vsel %vm704_vm3, %v2284_v53, %v2283_v47 }
0x1047   :  { %2290 = vrot.lane.b32.xlu0 %v2289_v1, %s4497_s19 }
0x1096   :  { %v2202_v22 = vpop.permute.xlu0 %2201 }
0x1097   :  { %v2204_v48 = vmul.f32 %v2202_v22, %v5215_v45  ;;  %v2571_v45 = vrot.slane %v727_v3, %v5250_v59 }
0x1099   :  { %v2207_v29 = vrot.slane %v2204_v48, 3  ;;  %v2208_v62 = vrot.slane %v2204_v48, 4  ;;  %v2206_v13 = vrot.slane %v2204_v48, 2  ;;  %v2209_v5 = vrot.slane %v2204_v48, 5 }
0x109a   :  { %v2572_v19 = vcombine.high %v2571_v45, %v2571_v45  ;;  %v5263_v53 = vrot.slane %v2571_v45, %v5250_v59  ;;  %v5283_v45 = vsub.s32 0, %v2569_v52 }
0x109b   :  { %v2215_v16 = vadd.f32 %v2207_v29, %v4873_v58  ;;  %v2216_v34 = vadd.f32 %v2208_v62, %v4876_v60  ;;  %v2214_v17 = vadd.f32 %v2206_v13, %v4879_v7  ;;  %v2217_v21 = vadd.f32 %v2209_v5, %v4883_v11 }
0x109c   :  { %v2586_v1 = vrot.slane %v2572_v19, %v5250_v59  ;;  %v2587_v62 = vcombine.high %v5263_v53, %v5263_v53 }
0x10a5   :  { %v2243_v15 = vpop.permute.xlu0 %2242 }
0x10a6   :  { %v2241_v18 = vpop.permute.xlu1 %2240  ;;  %v2252_v24 = vmul.f32 %v2243_v15, %v2216_v34  ;;  %v2588_v15 = vcombine.high %v2586_v1, %v2586_v1 }
0x10a7   :  { %v2251_v20 = vmul.f32 %v2241_v18, %v2215_v16 }
0x10a8   :  { %v2272_v28 = vrot.slane %v2252_v24, 6 }
0x10a9   :  { %v2239_v23 = vpop.permute.xlu0 %2238  ;;  %v2270_v25 = vrot.slane %v2251_v20, 7 }
0x10aa   :  { %v2245_v56 = vpop.permute.xlu1 %2244  ;;  %v2250_v0 = vmul.f32 %v2239_v23, %v2214_v17 }
0x10ab   :  { %v2253_v49 = vmul.f32 %v2245_v56, %v2217_v21 }
0x10ac   :  { %v2271_v30 = vsel %vm1754_vm11, %v2270_v25, %v2250_v0 }
0x10ad   :  { %v2273_v32 = vrot.slane %v2253_v49, 5  ;;  %v5260_v47 = vsel %vm232_vm2, %v2271_v30, %v2282_v27  ;;  %v2304_v36 = vpop.permute.xlu0 %2303 }
0x10ae   :  { %v2302_v43 = vpop.permute.xlu1 %2301 }
0x10af   :  { %v2307_v22 = vsel %vm232_vm2, %v2271_v30, %v2302_v43  ;;  %v2274_v35 = vsel %vm704_vm3, %v2273_v32, %v2272_v28 }
0x10b0   :  { %v2312_v2 = vrot.slane %v2307_v22, 6  ;;  %v5269_v42 = vsel %vm232_vm2, %v2274_v35, %v2285_v33  ;;  %v2308_v48 = vsel %vm232_vm2, %v2274_v35, %v2304_v36 }
0x10b1   :  { %v2313_v27 = vrot.slane %v2308_v48, 6  ;;  %v1261_v51 = vpop.permute.xlu0 %1260 }
0x10b2   :  { %v1007_v41 = vpop.permute.xlu1 %1006  ;;  %v1264_v29 = vsel %vm650_vm13, %v5018_v44, %v1261_v51 }
0x10b3   :  { %v1010_v3 = vsel %vm650_vm13, %v4965_v31, %v1007_v41  ;;  %v1265_v13 = vsel %vm726_vm14, %v1264_v29, %v1261_v51  ;;  %v2314_v33 = vsel %vm2311_vm15, %v2312_v2, %v2313_v27 }
0x10b4   :  { %v1011_v16 = vsel %vm726_vm14, %v1010_v3, %v1007_v41  ;;  %v2634_v5 = vcombine.high %v1265_v13, %v1265_v13  ;;  %v2641_v18 = vrot.slane %v1265_v13, %v5250_v59  ;;  %3962 = vmatmul.mubr.msk.f32.vlgmr.msra.gmra.mrb[20].mxu0 %vm754_vm7, %v2314_v33  ;;  %vm3038_vm7 = vcmask 1044480  }
0x10b5   :  { %v2594_v44 = vcombine.high %v1011_v16, %v1011_v16  ;;  %v2601_v34 = vrot.slane %v1011_v16, %v5250_v59  ;;  %v1771_v20 = vpop.permute.xlu0 %1770 }
0x10b6   :  { %v2648_v31 = vrot.slane %v2634_v5, %v5250_v59  ;;  %v2649_v17 = vcombine.high %v2641_v18, %v2641_v18  ;;  %v2657_v24 = vrot.slane %v2641_v18, %v5250_v59  ;;  %v1515_v21 = vpop.permute.xlu1 %1514  ;;  %v1774_v23 = vsel %vm650_vm13, %v5124_v39, %v1771_v20 }
0x10b7   :  { %v2608_v25 = vrot.slane %v2594_v44, %v5250_v59  ;;  %v2609_v56 = vcombine.high %v2601_v34, %v2601_v34  ;;  %v2616_v52 = vrot.slane %v2601_v34, %v5250_v59  ;;  %v1518_v0 = vsel %vm650_vm13, %v5071_v14, %v1515_v21 }
0x10b8   :  { %v2650_v19 = vcombine.high %v2648_v31, %v2648_v31  ;;  %v2664_v49 = vrot.slane %v2648_v31, %v5250_v59  ;;  %v2671_v30 = vrot.slane %v2649_v17, %v5250_v59  ;;  %v2679_v28 = vcombine.high %v2657_v24, %v2657_v24 }
0x10b9   :  { %v2623_v32 = vrot.slane %v2608_v25, %v5250_v59  ;;  %v2630_v36 = vrot.slane %v2609_v56, %v5250_v59  ;;  %v2631_v43 = vcombine.high %v2616_v52, %v2616_v52  ;;  %v1519_v39 = vsel %vm726_vm14, %v1518_v0, %v1515_v21 }
0x10ba   :  { %v2678_v22 = vrot.slane %v2650_v19, %v5250_v59  ;;  %v2680_v35 = vcombine.high %v2671_v30, %v2671_v30  ;;  %v2903_v2 = vrot.slane %v2679_v28, %v5283_v45  ;;  %v2911_v14 = vrot.slane %v2664_v49, %v5283_v45 }
0x10bb   :  { %v2632_v48 = vcombine.high %v2630_v36, %v2630_v36  ;;  %v2883_v27 = vrot.slane %v2630_v36, %v5283_v45  ;;  %v2887_v51 = vrot.slane %v2631_v43, %v5283_v45  ;;  %v2895_v41 = vrot.slane %v2623_v32, %v5283_v45 }
0x10bc   :  { %v2907_v29 = vrot.slane %v2680_v35, %v5283_v45  ;;  %v2915_v3 = vrot.slane %v2678_v22, %v5283_v45  ;;  %v2682_v13 = vcombine.high %v1519_v39, %v1519_v39  ;;  %v2689_v33 = vrot.slane %v1519_v39, %v5250_v59 }
0x10bd   :  { %v2891_v16 = vrot.slane %v2632_v48, %v5283_v45  ;;  %v3021_v5 = vsel %vm3020_vm5, %v5263_v53, %v2883_v27  ;;  %v3022_v18 = vsel %vm3020_vm5, %v2586_v1, %v2887_v51  ;;  %v3024_v44 = vsel %vm3020_vm5, %v2588_v15, %v2895_v41 }
0x10be   :  { %v3025_v34 = vsel %vm2311_vm15, %v3021_v5, %v2903_v2  ;;  %v3026_v31 = vsel %vm2311_vm15, %v3022_v18, %v2907_v29  ;;  %v2696_v17 = vrot.slane %v2682_v13, %v5250_v59  ;;  %v2697_v24 = vcombine.high %v2689_v33, %v2689_v33 }
0x10bf   :  { %v3023_v21 = vsel %vm3020_vm5, %v2587_v62, %v2891_v16  ;;  %v1775_v25 = vsel %vm726_vm14, %v1774_v23, %v1771_v20  ;;  %v3028_v15 = vsel %vm2311_vm15, %v3024_v44, %v2915_v3 }
0x10c0   :  { %v3027_v56 = vsel %vm2311_vm15, %v3023_v21, %v2911_v14  ;;  %v2698_v52 = vcombine.high %v2696_v17, %v2696_v17  ;;  %v2705_v53 = vrot.slane %v2696_v17, %v5250_v59  ;;  %v2712_v1 = vrot.slane %v2697_v24, %v5250_v59 }
0x10c1   :  { %v2723_v0 = vcombine.high %v1775_v25, %v1775_v25 }
0x10c2   :  { %v2719_v19 = vrot.slane %v2698_v52, %v5250_v59  ;;  %v2720_v49 = vcombine.high %v2705_v53, %v2705_v53  ;;  %v2721_v30 = vcombine.high %v2712_v1, %v2712_v1  ;;  %v2927_v28 = vrot.slane %v2705_v53, %v5283_v45 }
0x10c3   :  { %v2730_v62 = vrot.slane %v2723_v0, %v5250_v59 }
0x10c4   :  { %v2923_v20 = vrot.slane %v2721_v30, %v5283_v45  ;;  %v2931_v23 = vrot.slane %v2719_v19, %v5283_v45  ;;  %v2935_v32 = vrot.slane %v2720_v49, %v5283_v45  ;;  %v3030_v36 = vsel %vm2046_vm12, %v3026_v31, %v2927_v28 }
0x10c5   :  { %v2731_v43 = vcombine.high %v2730_v62, %v2730_v62  ;;  %v2738_v39 = vrot.slane %v2730_v62, %v5250_v59  ;;  %v2024_v19 = vrot.slane %v5144_v54, 3 }
0x10c6   :  { %v3029_v22 = vsel %vm2046_vm12, %v3025_v34, %v2923_v20  ;;  %v3031_v35 = vsel %vm2046_vm12, %v3027_v56, %v2931_v23  ;;  %v3032_v2 = vsel %vm2046_vm12, %v3028_v15, %v2935_v32  ;;  %v3057_v32 = vld [vmem:[%s5618_s11] sm:$0xff] }
0x10c7   :  { %v2745_v14 = vrot.slane %v2731_v43, %v5250_v59  ;;  %v2746_v48 = vcombine.high %v2738_v39, %v2738_v39  ;;  %v2943_v27 = vrot.slane %v2738_v39, %v5283_v45  ;;  %v3059_v39 = vld [vmem:[%s5618_s11 + $0x10] sm:$0xff] }
0x10c9   :  { %v2747_v51 = vcombine.high %v2745_v14, %v2745_v14  ;;  %v2947_v41 = vrot.slane %v2745_v14, %v5283_v45  ;;  %v2951_v29 = vrot.slane %v2746_v48, %v5283_v45  ;;  %v5337_v3 = vsel %vm3033_vm6, %v3029_v22, %v2943_v27  ;;  %v3060_v22 = vld [vmem:[%s5618_s11 + $0x18] sm:$0xff]  ;;  %v3306_v14 = vld [vmem:[%s5622_s15 + $0x8] sm:$0xff] }
0x10cb   :  { %v2955_v13 = vrot.slane %v2747_v51, %v5283_v45  ;;  %v5340_v33 = vsel %vm3033_vm6, %v3030_v36, %v2947_v41  ;;  %v5342_v16 = vsel %vm3033_vm6, %v3031_v35, %v2951_v29  ;;  %v3058_v36 = vld [vmem:[%s5618_s11 + $0x8] sm:$0xff]  ;;  %v4143_v35 = vpack.c.bf16 %v3060_v22, %v3059_v39 }
0x10cc   :  { %v4139_v43 = vpack.c.bf16 %v3058_v36, %v3057_v32 }
0x10cd   :  { %v5344_v5 = vsel %vm3033_vm6, %v3032_v2, %v2955_v13  ;;  %v3305_v2 = vld [vmem:[%s5622_s15] sm:$0xff] }
0x10ce   :  { %4140 = vmatprep.subr.bf16.mxu1 %v4139_v43  ;;  %v5387_v27 = vpack.c.bf16 %v3306_v14, %v3305_v2 }
0x1187   :  { %v2383_v18 = vpop.f32.mrb[20].mxu0 }
0x1188   :  { %v2384_v44 = vadd.f32 %v5196_v8, %v2383_v18  ;;  %v3963_v34 = vpop.f32.mrb[21].mxu0 }
0x118a   :  { %v2387_v31 = vmax.f32 %v2384_v44, 0.0 }
0x118c   :  { %3973 = vmatmul.mubr.msk.f32.vlgmr.msra.gmra.mrb[20].mxu1 %vm232_vm2, %v2387_v31 }
0x118d   :  { %4142 = vmatpush3.bf16.msra.mxu1 %v4139_v43 }
0x118e   :  { %4144 = vmatprep.subr.bf16.mxu1 %v4143_v35 }
0x1191   :  { %4146 = vmatpush3.bf16.msra.mxu1 %v4143_v35 }
0x1192   :  { %4156 = vmatprep.subr.bf16.mxu1 %v5387_v27 }
0x125f   :  { %v2457_v17 = vpop.f32.mrb[20].mxu1 }
0x1260   :  { %v5349_v24 = vadd.f32 %v5212_v26, %v2457_v17  ;;  %v3974_v21 = vpop.f32.mrb[21].mxu1  ;;  %v3170_v17 = vld [vmem:[%s5620_s13 + $0x8] sm:$0xff] }
0x1262   :  { %v2461_v25 = vmul.f32 1.442695, %v5349_v24 }
0x1264   :  { %4352 = vpow2.f32 %v2461_v25  ;;  %v2291_v25 = vpop.permute.xlu0 %2290 }
0x126e   :  { %v4353_v56 = vpop.eup %4352 }
0x126f   :  { %v2463_v52 = vadd.f32 1e-08, %v4353_v56 }
0x1271   :  { %4354 = vrcp.f32 %v2463_v52  ;;  %v2296_v52 = vsel %vm650_vm13, %v5269_v42, %v2291_v25 }
0x127b   :  { %v4355_v53 = vpop.eup %4354 }
0x127c   :  { %2466 = vrot.lane.b32.xlu1 %v4355_v53, %s4492_s4  ;;  %v2484_v1 = vrot.slane %v4355_v53, 2  ;;  %v2483_v8 = vrot.slane %v4355_v53, 1  ;;  %v2485_v0 = vrot.slane %v4355_v53, 3  ;;  %v2486_v15 = vrot.slane %v4355_v53, 4 }
0x127e   :  { %v2492_v49 = vadd.f32 %v2484_v1, %v4772_v37  ;;  %v2491_v26 = vadd.f32 %v2483_v8, %v4776_v38  ;;  %v2493_v30 = vadd.f32 %v2485_v0, %v4796_v46  ;;  %v2494_v28 = vadd.f32 %v2486_v15, %v4780_v40 }
0x127f   :  { %v2554_v38 = vrot.slane %v5349_v24, 1  ;;  %v2298_v1 = vsel %vm726_vm14, %v2296_v52, %v2291_v25 }
0x1280   :  { %2025 = vrot.lane.b32.xlu1 %v2024_v19, %s4497_s19  ;;  %4356 = vrcp.f32 %v2492_v49  ;;  %v2822_v15 = vrot.slane %v2298_v1, %v5250_v59 }
0x1281   :  { %4358 = vrcp.f32 %v2491_v26 }
0x1282   :  { %4360 = vrcp.f32 %v2493_v30  ;;  %v2823_v26 = vcombine.high %v2822_v15, %v2822_v15 }
0x1283   :  { %4362 = vrcp.f32 %v2494_v28 }
0x128a   :  { %v4357_v62 = vpop.eup %4356 }
0x128b   :  { %v4359_v20 = vpop.eup %4358  ;;  %2505 = vrot.lane.b32.xlu1 %v4357_v62, %s4492_s4  ;;  %v2520_v23 = vadd.f32 1e-08, %v4357_v62 }
0x128c   :  { %v4361_v54 = vpop.eup %4360  ;;  %2503 = vrot.lane.b32.xlu0 %v4359_v20, %s4492_s4  ;;  %v2519_v8 = vadd.f32 1e-08, %v4359_v20 }
0x128d   :  { %v4363_v37 = vpop.eup %4362  ;;  %v2521_v46 = vadd.f32 1e-08, %v4361_v54  ;;  %4364 = vlog2.f32 %v2520_v23 }
0x128e   :  { %v2522_v40 = vadd.f32 1e-08, %v4363_v37 }
0x128f   :  { %2555 = vrot.lane.b32.xlu1 %v2554_v38, %s4497_s19  ;;  %4366 = vlog2.f32 %v2521_v46  ;;  %v2837_v46 = vrot.slane %v2823_v26, %v5250_v59 }
0x1290   :  { %2507 = vrot.lane.b32.xlu0 %v4361_v54, %s4492_s4  ;;  %4368 = vlog2.f32 %v2522_v40 }
0x1291   :  { %4370 = vlog2.f32 %v2519_v8  ;;  %v2995_v22 = vrot.slane %v2837_v46, %v5283_v45 }
0x1293   :  { %638 = vrot.lane.b32.xlu1 %v4759_v6, %s4497_s19 }
0x1294   :  { %2509 = vrot.lane.b32.xlu0 %v4363_v37, %s4492_s4  ;;  %s4500_s4 = smov [#allocation8]  }
0x1295   :  { %s3534_s26 = sshll.u32 %s4500_s4, 4  ;;  %s5532_s26 = int_to_ptr.vmem [resolvable:$true] %s3534_s26 }
0x1297   :  { %v4365_v48 = vpop.eup %4364  ;;  %642 = vrot.lane.b32.xlu1 %v4765_v12, %s4497_s19 }
0x1298   :  { %640 = vrot.lane.b32.xlu0 %v4757_v4, %s4497_s19  ;;  %v2526_v6 = vmul.f32 0.6931472, %v4365_v48  ;;  %v3169_v4 = vld [vmem:[%s5620_s13] sm:$0xff] }
0x1299   :  { %v4367_v51 = vpop.eup %4366  ;;  %v4147_v21 = vpack.c.bf16 %v3170_v17, %v3169_v4 }
0x129a   :  { %v4369_v41 = vpop.eup %4368  ;;  %v2528_v29 = vmul.f32 0.6931472, %v4367_v51  ;;  %v2546_v13 = vrot.slane %v2526_v6, 7  ;;  %v2830_v6 = vrot.slane %v2822_v15, %v5250_v59 }
0x129b   :  { %v2530_v18 = vmul.f32 0.6931472, %v4369_v41  ;;  %4148 = vmatprep.subr.bf16.mxu0 %v4147_v21  ;;  %v4371_v35 = vpop.eup %4370 }
0x129c   :  { %644 = vrot.lane.b32.xlu0 %v4763_v10, %s4497_s19  ;;  %v2547_v44 = vrot.slane %v2528_v29, 6  ;;  %4150 = vmatpush3.bf16.msra.mxu0 %v4147_v21  ;;  %v2295_v10 = vsel %vm650_vm13, %v5260_v47, %v2291_v25  ;;  %v2524_v17 = vmul.f32 0.6931472, %v4371_v35  ;;  %v2991_v1 = vrot.slane %v2830_v6, %v5283_v45 }
0x129d   :  { %v2549_v34 = vrot.slane %v2530_v18, 5  ;;  %v2297_v56 = vsel %vm726_vm14, %v2295_v10, %v2291_v25 }
0x129e   :  { %v2548_v12 = vsel %vm704_vm3, %v2547_v44, %v2546_v13  ;;  %v2791_v53 = vcombine.high %v2297_v56, %v2297_v56 }
0x129f   :  { %v5396_v31 = vsel %vm707_vm4, %v2549_v34, %v2548_v12 }
0x12a0   :  { %v2798_v0 = vrot.slane %v2791_v53, %v5250_v59 }
0x12a2   :  { %v2799_v49 = vcombine.high %v2798_v0, %v2798_v0  ;;  %v2806_v37 = vrot.slane %v2798_v0, %v5250_v59 }
0x12a4   :  { %v2813_v38 = vrot.slane %v2799_v49, %v5250_v59  ;;  %v2814_v43 = vcombine.high %v2806_v37, %v2806_v37 }
0x12a6   :  { %v2815_v39 = vcombine.high %v2813_v38, %v2813_v38  ;;  %v2983_v21 = vrot.slane %v2814_v43, %v5283_v45 }
0x12ee   :  { %v2467_v19 = vpop.permute.xlu1 %2466 }
0x12ef   :  { %v2469_v20 = vmul.f32 %v2467_v19, %v5349_v24 }
0x12f1   :  { %v2471_v36 = vrot.slane %v2469_v20, 1  ;;  %v2473_v51 = vrot.slane %v2469_v20, 3  ;;  %v2472_v12 = vrot.slane %v2469_v20, 2  ;;  %v2474_v19 = vrot.slane %v2469_v20, 4 }
0x12f2   :  { %v2026_v30 = vpop.permute.xlu1 %2025 }
0x12f3   :  { %v2030_v47 = vsel %vm650_vm13, %v5183_v50, %v2026_v30  ;;  %v2031_v28 = vsel %vm650_vm13, %v5178_v9, %v2026_v30  ;;  %v2479_v44 = vadd.f32 %v2471_v36, %v4879_v7  ;;  %v2481_v15 = vadd.f32 %v2473_v51, %v4876_v60  ;;  %v3307_v51 = vld [vmem:[%s5622_s15 + $0x10] sm:$0xff] }
0x12f4   :  { %v2032_v42 = vsel %vm726_vm14, %v2030_v47, %v2026_v30  ;;  %v2033_v62 = vsel %vm726_vm14, %v2031_v28, %v2026_v30  ;;  %v2480_v49 = vadd.f32 %v2472_v12, %v4873_v58 }
0x12f5   :  { %v2750_v23 = vcombine.high %v2032_v42, %v2032_v42  ;;  %v2781_v54 = vrot.slane %v2033_v62, %v5250_v59 }
0x12f7   :  { %v2757_v50 = vrot.slane %v2750_v23, %v5250_v59  ;;  %v2788_v40 = vrot.slane %v2781_v54, %v5250_v59  ;;  %v2482_v54 = vadd.f32 %v2474_v19, %v4883_v11 }
0x12f9   :  { %v2758_v9 = vcombine.high %v2757_v50, %v2757_v50  ;;  %v2765_v32 = vrot.slane %v2757_v50, %v5250_v59  ;;  %v2975_v24 = vrot.slane %v2788_v40, %v5283_v45 }
0x12fb   :  { %v2772_v2 = vrot.slane %v2758_v9, %v5250_v59  ;;  %v2773_v14 = vcombine.high %v2765_v32, %v2765_v32  ;;  %v3042_v48 = vsel %vm3038_vm7, %v5344_v5, %v2975_v24  ;;  %v2987_v5 = vrot.slane %v2815_v39, %v5283_v45 }
0x12fc   :  { %v5433_v41 = vsel %vm3043_vm8, %v3042_v48, %v2995_v22 }
0x12fd   :  { %v2774_v29 = vcombine.high %v2772_v2, %v2772_v2  ;;  %v2967_v13 = vrot.slane %v2773_v14, %v5283_v45  ;;  %v2506_v18 = vpop.permute.xlu1 %2505  ;;  %v2963_v34 = vrot.slane %v2772_v2, %v5283_v45 }
0x12fe   :  { %v2504_v4 = vpop.permute.xlu0 %2503  ;;  %v2516_v42 = vmul.f32 %v2506_v18, %v2480_v49 }
0x12ff   :  { %v2515_v25 = vmul.f32 %v2504_v4, %v2479_v44  ;;  %v3039_v10 = vsel %vm3038_vm7, %v5337_v3, %v2963_v34  ;;  %v3040_v56 = vsel %vm3038_vm7, %v5340_v33, %v2967_v13  ;;  %v2971_v52 = vrot.slane %v2774_v29, %v5283_v45  ;;  %v3308_v29 = vld [vmem:[%s5622_s15 + $0x18] sm:$0xff] }
0x1300   :  { %v3044_v7 = vsel %vm3043_vm8, %v3039_v10, %v2983_v21  ;;  %v3045_v53 = vsel %vm3043_vm8, %v3040_v56, %v2987_v5  ;;  %v2535_v38 = vrot.slane %v2516_v42, 7  ;;  %v4159_v44 = vpack.c.bf16 %v3308_v29, %v3307_v51  ;;  %v3406_v5 = vld [vmem:[%s5624_s17 + $0x8] sm:$0xff]  ;;  %v3595_v10 = vld [vmem:[%s5619_s12] ss:$0 sm:$0xff] }
0x1301   :  { %v2558_v8 = vsel %vm232_vm2, %v2515_v25, %v2524_v17  ;;  %v2556_v0 = vpop.permute.xlu1 %2555  ;;  %v3041_v3 = vsel %vm3038_vm7, %v5342_v16, %v2971_v52 }
0x1302   :  { %v2560_v33 = vsel %vm650_vm13, %v2558_v8, %v2556_v0  ;;  %v2508_v26 = vpop.permute.xlu0 %2507  ;;  %v3046_v30 = vsel %vm3043_vm8, %v3041_v3, %v2991_v1  ;;  %v3407_v1 = vld [vmem:[%s5624_s17 + $0x10] sm:$0xff]  ;;  %v3408_v8 = vld [vmem:[%s5624_s17 + $0x18] sm:$0xff] }
0x1303   :  { %v2562_v47 = vsel %vm726_vm14, %v2560_v33, %v2556_v0  ;;  %v2517_v28 = vmul.f32 %v2508_v26, %v2481_v15  ;;  %v4167_v33 = vpack.c.bf16 %v3408_v8, %v3407_v1 }
0x1304   :  { %v2840_v62 = vcombine.high %v2562_v47, %v2562_v47 }
0x1305   :  { %v639_v23 = vpop.permute.xlu1 %638  ;;  %v2536_v20 = vrot.slane %v2517_v28, 6 }
0x1306   :  { %v2847_v60 = vrot.slane %v2840_v62, %v5250_v59  ;;  %v651_v16 = vsel %vm650_vm13, %v4744_v57, %v639_v23  ;;  %v2510_v58 = vpop.permute.xlu0 %2509 }
0x1307   :  { %655 = vst [vmem:[#allocation7] sm:$0xff] %v651_v16  ;;  %v2518_v37 = vmul.f32 %v2510_v58, %v2482_v54  ;;  %v2537_v9 = vsel %vm704_vm3, %v2536_v20, %v2535_v38  ;;  %vm3048_vm3 = vcmask 1046528  }
0x1308   :  { %v2848_v46 = vcombine.high %v2847_v60, %v2847_v60 }
0x1309   :  { %v2538_v50 = vrot.slane %v2518_v37, 5  ;;  %v643_v40 = vpop.permute.xlu1 %642 }
0x130a   :  { %v653_v32 = vsel %vm650_vm13, %v4750_v63, %v643_v40  ;;  %v641_v24 = vpop.permute.xlu0 %640  ;;  %v2855_v11 = vrot.slane %v2848_v46, %v5250_v59 }
0x130b   :  { %v2539_v36 = vsel %vm707_vm4, %v2538_v50, %v2537_v9  ;;  %657 = vst [vmem:[#allocation7 + $0x10] sm:$0xff] %v653_v32  ;;  %v652_v57 = vsel %vm650_vm13, %v4742_v55, %v641_v24 }
0x130c   :  { %v2559_v43 = vsel %vm232_vm2, %v2539_v36, %v5396_v31  ;;  %656 = vst [vmem:[#allocation7 + $0x8] sm:$0xff] %v652_v57  ;;  %v2856_v39 = vcombine.high %v2855_v11, %v2855_v11 }
0x130d   :  { %v2561_v22 = vsel %vm650_vm13, %v2559_v43, %v2556_v0 }
0x130e   :  { %v2563_v35 = vsel %vm726_vm14, %v2561_v22, %v2556_v0  ;;  %v645_v63 = vpop.permute.xlu0 %644  ;;  %v3003_v2 = vrot.slane %v2856_v39, %v5283_v45 }
0x130f   :  { %v2863_v14 = vrot.slane %v2563_v35, %v5250_v59  ;;  %v654_v48 = vsel %vm650_vm13, %v4748_v61, %v645_v63 }
0x1310   :  { %658 = vst [vmem:[#allocation7 + $0x18] sm:$0xff] %v654_v48  ;;  %v3049_v55 = vsel %vm3048_vm3, %v3044_v7, %v3003_v2 }
0x1311   :  { %3053 = vst [vmem:[#allocation8] sm:$0xff] %v3049_v55  ;;  %3983 = vmatprep.mubr.msk.f32.mxu1 %vm232_vm2, %v3049_v55  ;;  %v2871_v31 = vrot.slane %v2863_v14, %v5250_v59  ;;  %v2864_v6 = vcombine.high %v2863_v14, %v2863_v14 }
0x1313   :  { %v3007_v13 = vrot.slane %v2871_v31, %v5283_v45  ;;  %v2878_v61 = vrot.slane %v2864_v6, %v5250_v59  ;;  %v2879_v18 = vcombine.high %v2871_v31, %v2871_v31  ;;  %v3171_v59 = vld [vmem:[%s5620_s13 + $0x10] sm:$0xff] }
0x1315   :  { %v3050_v34 = vsel %vm3048_vm3, %v3045_v53, %v3007_v13  ;;  %v3011_v12 = vrot.slane %v2878_v61, %v5283_v45  ;;  %v3015_v4 = vrot.slane %v2879_v18, %v5283_v45  ;;  %v3172_v45 = vld [vmem:[%s5620_s13 + $0x18] sm:$0xff] }
0x1316   :  { %3054 = vst [vmem:[#allocation8 + $0x8] sm:$0xff] %v3050_v34  ;;  %3984 = vmatmul.mubr.msk.f32.vlgmr.msra.gmra.mrb[22].mxu1 %vm232_vm2, %v3050_v34 }
0x1317   :  { %4158 = vmatpush3.bf16.msra.mxu1 %v5387_v27  ;;  %v3051_v17 = vsel %vm3048_vm3, %v3046_v30, %v3011_v12  ;;  %v3052_v21 = vsel %vm3048_vm3, %v5433_v41, %v3015_v4  ;;  %v4151_v27 = vpack.c.bf16 %v3172_v45, %v3171_v59  ;;  %v3405_v41 = vld [vmem:[%s5624_s17] sm:$0xff] }
0x1318   :  { %3055 = vst [vmem:[#allocation8 + $0x10] sm:$0xff] %v3051_v17  ;;  %3986 = vmatprep.mubr.msk.f32.mxu1 %vm232_vm2, %v3051_v17  ;;  %3056 = vst [vmem:[#allocation8 + $0x18] sm:$0xff] %v3052_v21  ;;  %4160 = vmatprep.subr.bf16.mxu1 %v4159_v44  ;;  %v4163_v25 = vpack.c.bf16 %v3406_v5, %v3405_v41  ;;  %v3609_v30 = vld [vmem:[%s5623_s16] ss:$0 sm:$0xff]  ;;  %s4499_s16 = smov [#allocation7]  }
0x1319   :  { %4152 = vmatprep.subr.bf16.mxu0 %v4151_v27  ;;  %s3522_s17 = sshll.u32 %s4499_s16, 4  ;;  %s3523_s17 = int_to_ptr.vmem [resolvable:$true] %s3522_s17 }
0x131a   :  { %3987 = vmatmul.mubr.msk.f32.gmra.mrb[24].mxu1 %vm232_vm2, %v3052_v21  ;;  %4154 = vmatpush3.bf16.msra.mxu0 %v4151_v27  ;;  %s4436_s28 = scalar_lea.vmem %s3523_s17, 512  ;;  %p4441_p3 = scmp.lt.s32.totalorder %s3523_s17, %s3523_s17 }
0x131b   :  { %4162 = vmatpush3.bf16.msra.mxu1 %v4159_v44  ;;  %4011 = vmatprep.mubr.msk.f32.mxu1 %vm232_vm2, %v3049_v55  ;;  %p4437_p2 = scmp.ne.s32.totalorder %s3523_s17, %s4436_s28  ;;  %p4442_p4 = scmp.lt.s32.totalorder %s4436_s28, %s4436_s28 }
0x131c   :  { %4164 = vmatprep.subr.bf16.mxu0 %v4163_v25 }
0x131d   :  { %p4443_p5 = por %p4442_p4, %p4441_p3 }
0x131e   :  { %4012 = vmatmul.mubr.msk.f32.vlgmr.msra.gmra.mrb[26].mxu1 %vm232_vm2, %v3050_v34 }
0x131f   :  { %4014 = vmatprep.mubr.msk.f32.mxu1 %vm232_vm2, %v3051_v17  ;;  %p4444_p6 = pnand %p4443_p5, %p4437_p2 }
0x1322   :  { %4015 = vmatmul.mubr.msk.f32.gmra.mrb[28].mxu1 %vm232_vm2, %v3052_v21 }
0x13e9   :  { %v3985_v56 = vpop.f32.mrb[22].mxu1 }
0x13ea   :  { %v3152_v52 = vadd.f32 %v3985_v56, %v3595_v10  ;;  %v3146_v7 = vpop.f32.mrb[23].mxu1 }
0x13eb   :  { %v3147_v53 = vadd.f32 %v3595_v10, %v3146_v7 }
0x13ec   :  { %v3166_v19 = vmax.f32 %v3152_v52, 0.0 }
0x13ed   :  { %v3165_v0 = vmax.f32 %v3147_v53, 0.0  ;;  %v3988_v15 = vpop.f32.mrb[24].mxu1 }
0x13ee   :  { %v3162_v3 = vadd.f32 %v3988_v15, %v3595_v10  ;;  %v3156_v49 = vpop.f32.mrb[25].mxu1 }
0x13ef   :  { %v3157_v26 = vadd.f32 %v3595_v10, %v3156_v49  ;;  %3997 = vmatprep.mubr.msk.f32.mxu0 %vm232_vm2, %v3165_v0 }
0x13f0   :  { %3998 = vmatmul.mubr.msk.f32.vlgmr.msra.gmra.mrb[22].mxu0 %vm232_vm2, %v3166_v19  ;;  %v3168_v42 = vmax.f32 %v3162_v3, 0.0 }
0x13f1   :  { %v3167_v47 = vmax.f32 %v3157_v26, 0.0  ;;  %v4013_v28 = vpop.f32.mrb[26].mxu1  ;;  %4166 = vmatpush3.bf16.msra.mxu0 %v4163_v25 }
0x13f2   :  { %v3388_v62 = vadd.f32 %v4013_v28, %v3609_v30  ;;  %v3382_v23 = vpop.f32.mrb[27].mxu1  ;;  %4168 = vmatprep.subr.bf16.mxu0 %v4167_v33 }
0x13f3   :  { %v3383_v54 = vadd.f32 %v3609_v30, %v3382_v23  ;;  %4000 = vmatprep.mubr.msk.f32.mxu0 %vm232_vm2, %v3167_v47 }
0x13f4   :  { %4001 = vmatmul.mubr.msk.f32.gmra.mrb[24].mxu0 %vm232_vm2, %v3168_v42  ;;  %v3402_v16 = vmax.f32 %v3388_v62, 0.0 }
0x13f5   :  { %v3401_v60 = vmax.f32 %v3383_v54, 0.0  ;;  %v4016_v20 = vpop.f32.mrb[28].mxu1  ;;  %4170 = vmatpush3.bf16.msra.mxu0 %v4167_v33 }
0x13f6   :  { %v3398_v58 = vadd.f32 %v4016_v20, %v3609_v30  ;;  %v3392_v37 = vpop.f32.mrb[29].mxu1 }
0x13f7   :  { %v3393_v38 = vadd.f32 %v3609_v30, %v3392_v37  ;;  %4025 = vmatprep.mubr.msk.f32.mxu0 %vm232_vm2, %v3401_v60 }
0x13f8   :  { %4026 = vmatmul.mubr.msk.f32.vlgmr.msra.gmra.mrb[26].mxu0 %vm232_vm2, %v3402_v16  ;;  %v3404_v50 = vmax.f32 %v3398_v58, 0.0 }
0x13f9   :  { %v3403_v46 = vmax.f32 %v3393_v38, 0.0 }
0x13fb   :  { %4028 = vmatprep.mubr.msk.f32.mxu0 %vm232_vm2, %v3403_v46 }
0x13fc   :  { %4029 = vmatmul.mubr.msk.f32.gmra.mrb[28].mxu0 %vm232_vm2, %v3404_v50 }
0x13fd   :  { %4447 = shalt.err (!%p4444_p6)
}
0x13fe   :  { %s4448_s7 = scalar_lea.hbm %s5630_s23, 512 }
0x13ff   :  { %p4449_p7 = scmp.ne.s32.totalorder %s5630_s23, %s4448_s7  ;;  %p4452_p8 = scmp.lt.u32.totalorder %s4448_s7, %s5630_s23 }
0x1401   :  { %p4454_p9 = pnand %p4452_p8, %p4449_p7 }
0x1403   :  { %4457 = shalt.err (!%p4454_p9)
}
0x1404   :  { %3528 = dma.vmem_to_hbm [thread:$0]  %s3523_s17, 512, %s5630_s23, [#allocation4], %s4489_s5, %s4489_s5, %s4490_s10  }
0x1405   :  { %s4458_s2 = scalar_lea.vmem %s5532_s26, 512  ;;  %p4463_p11 = scmp.lt.s32.totalorder %s5532_s26, %s5532_s26 }
0x1406   :  { %p4459_p10 = scmp.ne.s32.totalorder %s5532_s26, %s4458_s2  ;;  %p4464_p12 = scmp.lt.s32.totalorder %s4458_s2, %s4458_s2 }
0x1408   :  { %p4465_p13 = por %p4464_p12, %p4463_p11 }
0x140a   :  { %p4466_p0 = pnand %p4465_p13, %p4459_p10 }
0x140c   :  { %4469 = shalt.err (!%p4466_p0)
}
0x140d   :  { %s4470_s21 = scalar_lea.hbm %s5631_s24, 512 }
0x140e   :  { %p4471_p1 = scmp.ne.s32.totalorder %s5631_s24, %s4470_s21  ;;  %p4474_p2 = scmp.lt.u32.totalorder %s4470_s21, %s5631_s24 }
0x1410   :  { %p4476_p3 = pnand %p4474_p2, %p4471_p1 }
0x1412   :  { %4479 = shalt.err (!%p4476_p3)
}
0x1413   :  { %3540 = dma.vmem_to_hbm [thread:$0]  %s5532_s26, 512, %s5631_s24, [#allocation9], %s4489_s5, %s4489_s5, %s4490_s10  }
0x1414   :  { %v3600_v40 = vld [vmem:[%s5621_s14] ss:$0 sm:$0xff]  ;;  %s5668_s5 = sld [smem:[#allocation26_spill]]  ;;  %s5669_s19 = sld [smem:[#allocation25_spill]] }
0x1415   :  { %v3614_v63 = vld [vmem:[%s5625_s18] ss:$0 sm:$0xff] }
0x14c3   :  { %v3999_v9 = vpop.f32.mrb[22].mxu0 }
0x14c4   :  { %v3264_v32 = vadd.f32 %v3999_v9, %v3600_v40  ;;  %v3258_v24 = vpop.f32.mrb[23].mxu0 }
0x14c5   :  { %v3259_v11 = vadd.f32 %v3600_v40, %v3258_v24 }
0x14c6   :  { %v3606_v36 = vmul.f32 -1.442695, %v3264_v32 }
0x14c7   :  { %v3605_v57 = vmul.f32 -1.442695, %v3259_v11  ;;  %v4002_v43 = vpop.f32.mrb[24].mxu0 }
0x14c8   :  { %4372 = vpow2.f32 %v3606_v36  ;;  %v3274_v39 = vadd.f32 %v4002_v43, %v3600_v40  ;;  %v3268_v22 = vpop.f32.mrb[25].mxu0 }
0x14c9   :  { %4374 = vpow2.f32 %v3605_v57  ;;  %v3269_v35 = vadd.f32 %v3600_v40, %v3268_v22 }
0x14ca   :  { %v3608_v2 = vmul.f32 -1.442695, %v3274_v39 }
0x14cb   :  { %v3607_v14 = vmul.f32 -1.442695, %v3269_v35  ;;  %v4027_v48 = vpop.f32.mrb[26].mxu0 }
0x14cc   :  { %4376 = vpow2.f32 %v3608_v2  ;;  %v3500_v55 = vadd.f32 %v4027_v48, %v3614_v63  ;;  %v3494_v31 = vpop.f32.mrb[27].mxu0 }
0x14cd   :  { %4378 = vpow2.f32 %v3607_v14  ;;  %v3495_v6 = vadd.f32 %v3614_v63, %v3494_v31 }
0x14ce   :  { %3514 = vst.msk [vmem:[%s5668_s5 + $0x8] sm:$0xff] %vm380_vm1, %v3500_v55 }
0x14cf   :  { %3513 = vst.msk [vmem:[%s5668_s5] sm:$0xff] %vm380_vm1, %v3495_v6  ;;  %v4030_v51 = vpop.f32.mrb[28].mxu0 }
0x14d0   :  { %v3510_v29 = vadd.f32 %v4030_v51, %v3614_v63  ;;  %v3504_v13 = vpop.f32.mrb[29].mxu0 }
0x14d1   :  { %v3505_v61 = vadd.f32 %v3614_v63, %v3504_v13 }
0x14d2   :  { %v4373_v18 = vpop.eup %4372  ;;  %3516 = vst.msk [vmem:[%s5668_s5 + $0x18] sm:$0xff] %vm380_vm1, %v3510_v29 }
0x14d3   :  { %v4375_v44 = vpop.eup %4374  ;;  %v3290_v34 = vadd.f32 1.0, %v4373_v18  ;;  %3515 = vst.msk [vmem:[%s5668_s5 + $0x10] sm:$0xff] %vm380_vm1, %v3505_v61 }
0x14d4   :  { %v3289_v12 = vadd.f32 1.0, %v4375_v44 }
0x14d5   :  { %4380 = vrcp.f32 %v3290_v34 }
0x14d6   :  { %v4377_v4 = vpop.eup %4376  ;;  %4382 = vrcp.f32 %v3289_v12 }
0x14d7   :  { %v4379_v17 = vpop.eup %4378  ;;  %v3292_v21 = vadd.f32 1.0, %v4377_v4 }
0x14d8   :  { %v3291_v59 = vadd.f32 1.0, %v4379_v17 }
0x14d9   :  { %4384 = vrcp.f32 %v3292_v21 }
0x14da   :  { %4386 = vrcp.f32 %v3291_v59 }
0x14df   :  { %v4381_v45 = vpop.eup %4380 }
0x14e0   :  { %v4383_v27 = vpop.eup %4382  ;;  %3302 = vst.msk [vmem:[%s5669_s19 + $0x8] sm:$0xff] %vm119_vm0, %v4381_v45 }
0x14e1   :  { %3301 = vst.msk [vmem:[%s5669_s19] sm:$0xff] %vm119_vm0, %v4383_v27 }
0x14e3   :  { %v4385_v41 = vpop.eup %4384 }
0x14e4   :  { %v4387_v5 = vpop.eup %4386  ;;  %3304 = vst.msk [vmem:[%s5669_s19 + $0x18] sm:$0xff] %vm119_vm0, %v4385_v41 }
0x14e5   :  { %3303 = vst.msk [vmem:[%s5669_s19 + $0x10] sm:$0xff] %vm119_vm0, %v4387_v5 }
0x14e6   :  { %4484 = dma.done.wait [#allocation4], 512  }
0x14e7   :  { %4485 = vsyncadd [#allocation4], 4294966784 }
0x14e8   :  { %4486 = dma.done.wait [#allocation9], 512  }
0x14e9   :  { %4487 = vsyncadd [#allocation9], 4294966784 }
0x14ea   :  { %3555 = vsyncpa [#allocation3], 1 }
0x14eb   :  { %3556 = vsyncpa [#allocation6], 1 }
0x14ec   :  { %3557 = vsyncpa [#allocation4], 1 }
0x14ed   :  { %3558 = vsyncpa [#allocation9], 1 }

</bundles_post_ra>
